<compile_context>
chip_gen: v7x
topology: tpu7x:2x2x1
jax: 0.10.0
libtpu: 0.0.40
codegen_flags: <defaults>
</compile_context>

<pallas_src>
import functools

import jax
import jax.numpy as jnp
from jax import lax
from jax.experimental import pallas as pl
from jax.experimental.pallas import tpu as pltpu

EPS = 1e-5  # LayerNorm eps (PyTorch default)


def _vmem_capacity_bytes():
    """Physical VMEM per core (128 MiB v5e/v6e, 64 MiB v7x); safe fallback."""
    try:
        cap = int(pltpu.get_tpu_info().vmem_capacity_bytes)
        if cap > 0:
            return cap
    except Exception:
        pass
    return 64 * 1024 * 1024  # conservative (v7x per-TC VMEM)


# ---------------------------------------------------------------------------
# Kernel 1: input LayerNorm + fused projection/gate/gating matmul (+mask,
# sigmoid).  Emits a, b, gating pre-activation in channel-major flat layout.
# ---------------------------------------------------------------------------
def _proj_gate_kernel(pair_ref, maskt_ref, lnw_ref, lnb_ref, w5_ref,
                      a_ref, b_ref, g_ref):
    x = pair_ref[...]                                     # [ti, N, C] f32
    mu = jnp.mean(x, axis=-1, keepdims=True)
    xc = x - mu
    var = jnp.mean(xc * xc, axis=-1, keepdims=True)
    ln = xc * lax.rsqrt(var + EPS)
    ln = ln * lnw_ref[...][None] + lnb_ref[...][None]     # [ti, N, C]

    t, n, c = ln.shape
    ln2d = ln.reshape(t * n, c).astype(jnp.bfloat16)      # bf16 BEFORE any relayout
    # One fused bf16 matmul: rows = [Wp_a | Wp_b | Wg_a | Wg_b | Wgl].
    # Contraction over the last dim of BOTH operands (flash q@k^T pattern):
    # no f32 activation transpose on the XLU.
    fused = lax.dot_general(w5_ref[...], ln2d,
                            dimension_numbers=(((1,), (1,)), ((), ())),
                            preferred_element_type=jnp.float32)  # [5C, ti*N]
    pa, pb = fused[0:c], fused[c:2 * c]
    ga, gb = fused[2 * c:3 * c], fused[3 * c:4 * c]
    gl = fused[4 * c:5 * c]

    m = maskt_ref[...]                                    # [1, ti*N] (mask over j)
    a_ref[...] = (pa * m * jax.nn.sigmoid(ga)).astype(a_ref.dtype)
    b_ref[...] = (pb * m * jax.nn.sigmoid(gb)).astype(b_ref.dtype)
    g_ref[...] = gl.astype(g_ref.dtype)                   # pre-sigmoid gating


# ---------------------------------------------------------------------------
# Kernel 2: triangle contraction, batched over a channel tile (bf16 MXU).
# ---------------------------------------------------------------------------
def _triangle_kernel(eq, a_ref, b_ref, z_ref):
    # TODO(synk): verify in the Mosaic dump that the incoming-case einsum does
    # not insert a hidden full-tile transpose (outgoing = q@k^T pattern, OK).
    z_ref[...] = jnp.einsum(
        eq, a_ref[...], b_ref[...],
        preferred_element_type=jnp.float32).astype(z_ref.dtype)


# ---------------------------------------------------------------------------
# Kernel 3: center LayerNorm (channel axis) + output projection +
# sigmoid(gating_linear) multiply — whole-tile, no per-row loop.
# ---------------------------------------------------------------------------
def _output_kernel(z_ref, g_ref, cnw_ref, cnb_ref, wo_ref, o_ref):
    z = z_ref[...].astype(jnp.float32)                    # [C, ti*N] channel-major
    mu = jnp.mean(z, axis=0, keepdims=True)
    zc = z - mu
    var = jnp.mean(zc * zc, axis=0, keepdims=True)
    zn = zc * lax.rsqrt(var + EPS) * cnw_ref[...] + cnb_ref[...]   # [C, ti*N]
    out = jnp.dot(wo_ref[...], zn.astype(jnp.bfloat16),
                  preferred_element_type=jnp.float32)     # ONE [C,C]x[C,ti*N] matmul
    out = out * jax.nn.sigmoid(g_ref[...].astype(jnp.float32))
    o_ref[...] = out.T.astype(o_ref.dtype)                # single [ti*N, C] store


# ---------------------------------------------------------------------------
# Tile pickers (largest tiles that fit a generation-aware VMEM budget).
# ---------------------------------------------------------------------------
def _row_tile_bytes(ti, n, c):
    rows = ti * n
    # K1: pair f32 in (x2 bufs) + 3 bf16 outs (x2) + w5 (x2) + in-kernel f32 LN
    # and the [5C, rows] f32 matmul result.
    k1 = (2 * rows * c * 4 + 2 * 3 * rows * c * 2 + 2 * 5 * c * c * 2
          + rows * c * (4 + 2) + 5 * c * rows * 4)
    # K3: z/g bf16 in (x2 each) + f32 out (x2) + wo (x2) + f32 temporaries.
    k3 = (2 * 2 * rows * c * 2 + 2 * rows * c * 4 + 2 * c * c * 2
          + 4 * rows * c * 4)
    return max(k1, k3)


def _pick_row_tile(n, c, budget):
    cands = [n] + [t for t in (256, 128, 64, 32, 16, 8) if t < n and n % t == 0]
    valid = [t for t in cands if (t * n) % 128 == 0 or t == n]
    for t in valid:                       # largest first
        if _row_tile_bytes(t, n, c) <= budget:
            return t
    return valid[-1] if valid else n


def _pick_triangle_tiles(c, n, outgoing, budget):
    ti2 = n
    if n > 256:
        for d in (256, 128, 64, 32, 16, 8):
            if n % d == 0:
                ti2 = d
                break
    # incoming tiles b's LAST dim by ti2 -> lane dim must be 128-aligned
    if not outgoing and ti2 != n and ti2 % 128 != 0:
        ti2 = n

    def step_bytes(t):
        # double-buffered bf16 operands + output, PLUS the f32 einsum result
        return 2 * 2 * t * (n * n + 2 * ti2 * n) + 4 * t * ti2 * n

    tc = c
    while tc > 1 and c % max(tc // 2, 1) == 0 and step_bytes(tc) > budget:
        tc //= 2
    # prefer >=2 channel blocks so the channel axis can shard across the two
    # TensorCores on v7x (keeps the minimum-HBM-traffic property)
    if tc == c and c % 2 == 0:
        tc = c // 2
    return tc, ti2


# ---------------------------------------------------------------------------
# Wrapper
# ---------------------------------------------------------------------------
def triangle_multiplication(pair, mask, params, *, outgoing=True,
                            ti=None, tc=None, ti2=None,
                            out_dtype=jnp.float32):
    n, n2, c = pair.shape
    assert n == n2, "pair must be [N, N, C]"
    f32, bf16 = jnp.float32, jnp.bfloat16
    pair = pair.astype(f32)

    vmem_cap = _vmem_capacity_bytes()
    vmem_limit = int(vmem_cap * 0.78)       # ~100 MiB on v5e/v6e, ~50 MiB on v7x
    tile_budget = int(vmem_limit * 0.6)

    if ti is None:
        ti = _pick_row_tile(n, c, tile_budget)
    auto_tc, auto_ti2 = _pick_triangle_tiles(c, n, outgoing, tile_budget)
    tc = auto_tc if tc is None else tc
    ti2 = auto_ti2 if ti2 is None else ti2
    assert n % ti == 0, f"N={n} must be divisible by row tile ti={ti}"
    assert (ti * n) % 128 == 0 or ti == n, "ti*N must be a multiple of 128"
    assert c % tc == 0 and n % ti2 == 0, "bad triangle tile sizes"

    # Weights stay in torch [out, in] orientation (channel-major math).
    # projection/gate: even output rows -> a, odd -> b (torch chunk semantics).
    wp = params["Wp"].astype(f32)                         # [2C, C]
    wg = params["Wg"].astype(f32)
    w5 = jnp.concatenate(
        [wp[0::2], wp[1::2], wg[0::2], wg[1::2], params["Wgl"].astype(f32)],
        axis=0).astype(bf16)                              # [5C, C]
    wo = params["Wo"].astype(bf16)                        # [C, C]
    lnw_in = params["ln_in_w"].reshape(1, c).astype(f32)
    lnb_in = params["ln_in_b"].reshape(1, c).astype(f32)
    cnw = params["ln_c_w"].reshape(c, 1).astype(f32)
    cnb = params["ln_c_b"].reshape(c, 1).astype(f32)
    # mask over j, repeated for each of the ti rows in a flat (i,j) block
    maskt = jnp.tile(mask.astype(f32), (ti,)).reshape(1, ti * n)

    def const(shape):
        return pl.BlockSpec(shape, lambda i: (0,) * len(shape))

    # ---------------- kernel 1: LN + fused proj/gate/gating ----------------
    row_in = pl.BlockSpec((ti, n, c), lambda i: (i, 0, 0))
    cm_out = pl.BlockSpec((c, ti * n), lambda i: (0, i))
    a_flat, b_flat, g_flat = pl.pallas_call(
        _proj_gate_kernel,
        out_shape=(jax.ShapeDtypeStruct((c, n * n), bf16),) * 3,
        grid_spec=pltpu.PrefetchScalarGridSpec(
            num_scalar_prefetch=0, grid=(n // ti,),
            in_specs=[row_in, const((1, ti * n)), const((1, c)), const((1, c)),
                      const((5 * c, c))],
            out_specs=[cm_out, cm_out, cm_out]),
        compiler_params=pltpu.CompilerParams(
            dimension_semantics=("parallel",), vmem_limit_bytes=vmem_limit),
        cost_estimate=pl.CostEstimate(
            flops=2 * n * n * c * 5 * c,
            transcendentals=2 * n * n * c,
            bytes_accessed=n * n * c * 4 + 3 * n * n * c * 2),
    )(pair, maskt, lnw_in, lnb_in, w5)

    # free, row-major-compatible views for the triangle contraction
    a_cm = a_flat.reshape(c, n, n)
    b_cm = b_flat.reshape(c, n, n)

    # ---------------- kernel 2: triangle contraction ----------------
    if outgoing:
        eq = "cik,cjk->cij"
        a_spec = pl.BlockSpec((tc, ti2, n), lambda cb, ib: (cb, ib, 0))
        b_spec = pl.BlockSpec((tc, n, n), lambda cb, ib: (cb, 0, 0))
    else:
        eq = "ckj,cki->cij"
        a_spec = pl.BlockSpec((tc, n, n), lambda cb, ib: (cb, 0, 0))
        b_spec = pl.BlockSpec((tc, n, ti2), lambda cb, ib: (cb, 0, ib))
    z_spec = pl.BlockSpec((tc, ti2, n), lambda cb, ib: (cb, ib, 0))
    z_cm = pl.pallas_call(
        functools.partial(_triangle_kernel, eq),
        out_shape=jax.ShapeDtypeStruct((c, n, n), bf16),
        grid_spec=pltpu.PrefetchScalarGridSpec(
            num_scalar_prefetch=0, grid=(c // tc, n // ti2),
            in_specs=[a_spec, b_spec], out_specs=z_spec),
        compiler_params=pltpu.CompilerParams(
            # channel axis is the megacore-parallel axis (v7x): never duplicate
            # the full-resident operand's HBM traffic across cores.
            dimension_semantics=("parallel", "arbitrary"),
            vmem_limit_bytes=vmem_limit),
        cost_estimate=pl.CostEstimate(
            flops=2 * c * n * n * n, transcendentals=0,
            bytes_accessed=3 * c * n * n * 2),
    )(a_cm, b_cm)

    # flat channel-major views for K3 (free reshapes)
    z_flat = z_cm.reshape(c, n * n)

    # ---------------- kernel 3: center LN + output proj + gating ----------------
    cm_in = pl.BlockSpec((c, ti * n), lambda i: (0, i))
    out_flat = pl.pallas_call(
        _output_kernel,
        out_shape=jax.ShapeDtypeStruct((n * n, c), out_dtype),
        grid_spec=pltpu.PrefetchScalarGridSpec(
            num_scalar_prefetch=0, grid=(n // ti,),
            in_specs=[cm_in, cm_in, const((c, 1)), const((c, 1)), const((c, c))],
            out_specs=pl.BlockSpec((ti * n, c), lambda i: (i, 0))),
        compiler_params=pltpu.CompilerParams(
            dimension_semantics=("parallel",), vmem_limit_bytes=vmem_limit),
        cost_estimate=pl.CostEstimate(
            flops=2 * n * n * c * c, transcendentals=n * n * c,
            bytes_accessed=2 * n * n * c * 2
            + n * n * c * jnp.dtype(out_dtype).itemsize),
    )(z_flat, g_flat, cnw, cnb, wo)
    return out_flat.reshape(n, n, c)


# ---------------------------------------------------------------------------
# Pure-JAX f32 reference that mirrors the PyTorch forward op-for-op.
# ---------------------------------------------------------------------------
def _layernorm_ref(x, w, b):
    mu = jnp.mean(x, axis=-1, keepdims=True)
    var = jnp.mean((x - mu) ** 2, axis=-1, keepdims=True)
    return (x - mu) / jnp.sqrt(var + EPS) * w + b


def reference(pair, mask, params, outgoing=True):
    C = pair.shape[-1]
    x = _layernorm_ref(pair, params["ln_in_w"], params["ln_in_b"])
    input_pair = x
    proj = x @ params["Wp"].T
    proj = jnp.transpose(proj, (2, 0, 1))
    proj = proj * mask[None, :]
    gate = x @ params["Wg"].T
    gate = jnp.transpose(gate, (2, 0, 1))
    proj = proj * jax.nn.sigmoid(gate)
    proj = proj.reshape(C, 2, *proj.shape[1:])
    a, b = proj[:, 0], proj[:, 1]
    eq = "cik,cjk->cij" if outgoing else "ckj,cki->cij"
    z = jnp.einsum(eq, a, b)
    z = jnp.transpose(z, (1, 2, 0))
    z = _layernorm_ref(z, params["ln_c_w"], params["ln_c_b"])
    out = z @ params["Wo"].T
    g = jax.nn.sigmoid(input_pair @ params["Wgl"].T)
    return out * g


if __name__ == "__main__":
    N_TOKEN, C_PAIR = 16, 128                             # c_pair default of the module
    key = jax.random.PRNGKey(0)
    ks = jax.random.split(key, 10)
    scale = 0.05
    params = {
        "ln_in_w": 1.0 + 0.1 * jax.random.normal(ks[0], (C_PAIR,), jnp.float32),
        "ln_in_b": 0.1 * jax.random.normal(ks[1], (C_PAIR,), jnp.float32),
        "Wp": scale * jax.random.normal(ks[2], (2 * C_PAIR, C_PAIR), jnp.float32),
        "Wg": scale * jax.random.normal(ks[3], (2 * C_PAIR, C_PAIR), jnp.float32),
        "ln_c_w": 1.0 + 0.1 * jax.random.normal(ks[4], (C_PAIR,), jnp.float32),
        "ln_c_b": 0.1 * jax.random.normal(ks[5], (C_PAIR,), jnp.float32),
        "Wo": scale * jax.random.normal(ks[6], (C_PAIR, C_PAIR), jnp.float32),
        "Wgl": scale * jax.random.normal(ks[7], (C_PAIR, C_PAIR), jnp.float32),
    }
    pair = jax.random.normal(ks[8], (N_TOKEN, N_TOKEN, C_PAIR), jnp.float32)
    mask = (jax.random.uniform(ks[9], (N_TOKEN,)) > 0.3).astype(jnp.float32)

    out = triangle_multiplication(pair, mask, params, outgoing=True)
    out = jax.block_until_ready(out)

    ref = reference(pair, mask, params, outgoing=True)
    assert out.shape == (N_TOKEN, N_TOKEN, C_PAIR)
    # bf16 intermediates / bf16 MXU matmuls -> looser tolerance vs f32 reference
    assert jnp.allclose(out, ref, atol=3e-2, rtol=3e-2), (
        float(jnp.max(jnp.abs(out - ref))))

    print("KERNEL_OK")
</pallas_src>

<mosaic_0001>
module attributes {stable_mosaic.version = 11 : i64} {
  func.func @_proj_gate_kernel(%arg0: i32, %arg1: memref<16x16x128xf32, #tpu.memory_space<vmem>>, %arg2: memref<1x256xf32, #tpu.memory_space<vmem>>, %arg3: memref<1x128xf32, #tpu.memory_space<vmem>>, %arg4: memref<1x128xf32, #tpu.memory_space<vmem>>, %arg5: memref<640x128xbf16, #tpu.memory_space<vmem>>, %arg6: memref<128x256xbf16, #tpu.memory_space<vmem>>, %arg7: memref<128x256xbf16, #tpu.memory_space<vmem>>, %arg8: memref<128x256xbf16, #tpu.memory_space<vmem>>) attributes {dimension_semantics = [#tpu.dimension_semantics<parallel>], iteration_bounds = array<i64: 1>, scalar_prefetch = 0 : i64, scratch_operands = 0 : i64, tpu.core_type = #tpu.core_type<tc>, window_params = [{transform_indices = @transform_0, window_bounds = array<i64: 16, 16, 128>}, {pipeline_mode = #tpu.pipeline_mode<synchronous>, transform_indices = @transform_1, window_bounds = array<i64: 1, 256>}, {pipeline_mode = #tpu.pipeline_mode<synchronous>, transform_indices = @transform_2, window_bounds = array<i64: 1, 128>}, {pipeline_mode = #tpu.pipeline_mode<synchronous>, transform_indices = @transform_3, window_bounds = array<i64: 1, 128>}, {pipeline_mode = #tpu.pipeline_mode<synchronous>, transform_indices = @transform_4, window_bounds = array<i64: 640, 128>}, {transform_indices = @transform_5, window_bounds = array<i64: 128, 256>}, {transform_indices = @transform_6, window_bounds = array<i64: 128, 256>}, {transform_indices = @transform_7, window_bounds = array<i64: 128, 256>}]} {
    %c0 = arith.constant 0 : index
    %c0_0 = arith.constant 0 : index
    %c0_1 = arith.constant 0 : index
    %0 = vector.load %arg1[%c0, %c0_0, %c0_1] : memref<16x16x128xf32, #tpu.memory_space<vmem>>, vector<16x16x128xf32>
    %cst = arith.constant dense<0.000000e+00> : vector<16x16xf32>
    %1 = vector.multi_reduction <add>, %0, %cst [2] : vector<16x16x128xf32> to vector<16x16xf32>
    %2 = vector.shape_cast %1 : vector<16x16xf32> to vector<16x16x1xf32>
    %cst_2 = arith.constant 1.280000e+02 : f32
    %3 = vector.broadcast %cst_2 : f32 to vector<16x16x1xf32>
    %4 = arith.divf %2, %3 : vector<16x16x1xf32>
    %5 = vector.broadcast %4 : vector<16x16x1xf32> to vector<16x16x128xf32>
    %6 = arith.subf %0, %5 : vector<16x16x128xf32>
    %7 = arith.mulf %6, %6 : vector<16x16x128xf32>
    %cst_3 = arith.constant dense<0.000000e+00> : vector<16x16xf32>
    %8 = vector.multi_reduction <add>, %7, %cst_3 [2] : vector<16x16x128xf32> to vector<16x16xf32>
    %9 = vector.shape_cast %8 : vector<16x16xf32> to vector<16x16x1xf32>
    %cst_4 = arith.constant 1.280000e+02 : f32
    %10 = vector.broadcast %cst_4 : f32 to vector<16x16x1xf32>
    %11 = arith.divf %9, %10 : vector<16x16x1xf32>
    %cst_5 = arith.constant 9.99999974E-6 : f32
    %12 = vector.broadcast %cst_5 : f32 to vector<16x16x1xf32>
    %13 = arith.addf %11, %12 : vector<16x16x1xf32>
    %14 = math.rsqrt %13 : vector<16x16x1xf32>
    %15 = vector.broadcast %14 : vector<16x16x1xf32> to vector<16x16x128xf32>
    %16 = arith.mulf %6, %15 : vector<16x16x128xf32>
    %c0_6 = arith.constant 0 : index
    %c0_7 = arith.constant 0 : index
    %17 = vector.load %arg3[%c0_6, %c0_7] : memref<1x128xf32, #tpu.memory_space<vmem>>, vector<1x128xf32>
    %18 = vector.shape_cast %17 : vector<1x128xf32> to vector<1x1x128xf32>
    %19 = vector.broadcast %18 : vector<1x1x128xf32> to vector<16x16x128xf32>
    %20 = arith.mulf %16, %19 : vector<16x16x128xf32>
    %c0_8 = arith.constant 0 : index
    %c0_9 = arith.constant 0 : index
    %21 = vector.load %arg4[%c0_8, %c0_9] : memref<1x128xf32, #tpu.memory_space<vmem>>, vector<1x128xf32>
    %22 = vector.shape_cast %21 : vector<1x128xf32> to vector<1x1x128xf32>
    %23 = vector.broadcast %22 : vector<1x1x128xf32> to vector<16x16x128xf32>
    %24 = arith.addf %20, %23 : vector<16x16x128xf32>
    %25 = vector.shape_cast %24 : vector<16x16x128xf32> to vector<256x128xf32>
    %26 = arith.truncf %25 : vector<256x128xf32> to vector<256x128xbf16>
    %c0_10 = arith.constant 0 : index
    %c0_11 = arith.constant 0 : index
    %27 = vector.load %arg5[%c0_10, %c0_11] : memref<640x128xbf16, #tpu.memory_space<vmem>>, vector<640x128xbf16>
    %cst_12 = arith.constant dense<0.000000e+00> : vector<640x256xf32>
    %28 = tpu.matmul %27, %26, %cst_12 {dimension_numbers = #tpu.dot_dimension_numbers<[1], [1], [0], [0], [0, 0, 1, 0], [], []>} : vector<640x128xbf16>, vector<256x128xbf16>, vector<640x256xf32> -> vector<640x256xf32>
    %29 = vector.extract_strided_slice %28 {offsets = [0, 0], sizes = [128, 256], strides = [1, 1]} : vector<640x256xf32> to vector<128x256xf32>
    %30 = vector.extract_strided_slice %28 {offsets = [128, 0], sizes = [128, 256], strides = [1, 1]} : vector<640x256xf32> to vector<128x256xf32>
    %31 = vector.extract_strided_slice %28 {offsets = [256, 0], sizes = [128, 256], strides = [1, 1]} : vector<640x256xf32> to vector<128x256xf32>
    %32 = vector.extract_strided_slice %28 {offsets = [384, 0], sizes = [128, 256], strides = [1, 1]} : vector<640x256xf32> to vector<128x256xf32>
    %33 = vector.extract_strided_slice %28 {offsets = [512, 0], sizes = [128, 256], strides = [1, 1]} : vector<640x256xf32> to vector<128x256xf32>
    %c0_13 = arith.constant 0 : index
    %c0_14 = arith.constant 0 : index
    %34 = vector.load %arg2[%c0_13, %c0_14] : memref<1x256xf32, #tpu.memory_space<vmem>>, vector<1x256xf32>
    %35 = vector.broadcast %34 : vector<1x256xf32> to vector<128x256xf32>
    %36 = arith.mulf %29, %35 : vector<128x256xf32>
    %37 = arith.negf %31 : vector<128x256xf32>
    %38 = math.exp %37 : vector<128x256xf32>
    %cst_15 = arith.constant 1.000000e+00 : f32
    %39 = vector.broadcast %cst_15 : f32 to vector<128x256xf32>
    %40 = arith.addf %39, %38 : vector<128x256xf32>
    %41 = arith.divf %39, %40 : vector<128x256xf32>
    %42 = arith.mulf %36, %41 : vector<128x256xf32>
    %43 = arith.truncf %42 : vector<128x256xf32> to vector<128x256xbf16>
    %c0_16 = arith.constant 0 : index
    %c0_17 = arith.constant 0 : index
    %44 = vector.load %arg6[%c0_16, %c0_17] : memref<128x256xbf16, #tpu.memory_space<vmem>>, vector<128x256xbf16>
    tpu.vector_store %arg6[%c0_16, %c0_17], %43 {strides = array<i32>} : memref<128x256xbf16, #tpu.memory_space<vmem>>, vector<128x256xbf16>,
    %45 = vector.broadcast %34 : vector<1x256xf32> to vector<128x256xf32>
    %46 = arith.mulf %30, %45 : vector<128x256xf32>
    %47 = arith.negf %32 : vector<128x256xf32>
    %48 = math.exp %47 : vector<128x256xf32>
    %cst_18 = arith.constant 1.000000e+00 : f32
    %49 = vector.broadcast %cst_18 : f32 to vector<128x256xf32>
    %50 = arith.addf %49, %48 : vector<128x256xf32>
    %51 = arith.divf %49, %50 : vector<128x256xf32>
    %52 = arith.mulf %46, %51 : vector<128x256xf32>
    %53 = arith.truncf %52 : vector<128x256xf32> to vector<128x256xbf16>
    %c0_19 = arith.constant 0 : index
    %c0_20 = arith.constant 0 : index
    %54 = vector.load %arg7[%c0_19, %c0_20] : memref<128x256xbf16, #tpu.memory_space<vmem>>, vector<128x256xbf16>
    tpu.vector_store %arg7[%c0_19, %c0_20], %53 {strides = array<i32>} : memref<128x256xbf16, #tpu.memory_space<vmem>>, vector<128x256xbf16>,
    %55 = arith.truncf %33 : vector<128x256xf32> to vector<128x256xbf16>
    %c0_21 = arith.constant 0 : index
    %c0_22 = arith.constant 0 : index
    %56 = vector.load %arg8[%c0_21, %c0_22] : memref<128x256xbf16, #tpu.memory_space<vmem>>, vector<128x256xbf16>
    tpu.vector_store %arg8[%c0_21, %c0_22], %55 {strides = array<i32>} : memref<128x256xbf16, #tpu.memory_space<vmem>>, vector<128x256xbf16>,
    return
  }
  func.func @transform_0(%arg0: i32) -> (i32, i32, i32) {
    %c0_i32 = arith.constant 0 : i32
    %c0_i32_0 = arith.constant 0 : i32
    %c0_i32_1 = arith.constant 0 : i32
    return %arg0, %c0_i32, %c0_i32_0 : i32, i32, i32
  }
  func.func @transform_1(%arg0: i32) -> (i32, i32) {
    %c0_i32 = arith.constant 0 : i32
    %c0_i32_0 = arith.constant 0 : i32
    %c0_i32_1 = arith.constant 0 : i32
    return %c0_i32, %c0_i32_0 : i32, i32
  }
  func.func @transform_2(%arg0: i32) -> (i32, i32) {
    %c0_i32 = arith.constant 0 : i32
    %c0_i32_0 = arith.constant 0 : i32
    %c0_i32_1 = arith.constant 0 : i32
    return %c0_i32, %c0_i32_0 : i32, i32
  }
  func.func @transform_3(%arg0: i32) -> (i32, i32) {
    %c0_i32 = arith.constant 0 : i32
    %c0_i32_0 = arith.constant 0 : i32
    %c0_i32_1 = arith.constant 0 : i32
    return %c0_i32, %c0_i32_0 : i32, i32
  }
  func.func @transform_4(%arg0: i32) -> (i32, i32) {
    %c0_i32 = arith.constant 0 : i32
    %c0_i32_0 = arith.constant 0 : i32
    %c0_i32_1 = arith.constant 0 : i32
    return %c0_i32, %c0_i32_0 : i32, i32
  }
  func.func @transform_5(%arg0: i32) -> (i32, i32) {
    %c0_i32 = arith.constant 0 : i32
    %c0_i32_0 = arith.constant 0 : i32
    return %c0_i32, %arg0 : i32, i32
  }
  func.func @transform_6(%arg0: i32) -> (i32, i32) {
    %c0_i32 = arith.constant 0 : i32
    %c0_i32_0 = arith.constant 0 : i32
    return %c0_i32, %arg0 : i32, i32
  }
  func.func @transform_7(%arg0: i32) -> (i32, i32) {
    %c0_i32 = arith.constant 0 : i32
    %c0_i32_0 = arith.constant 0 : i32
    return %c0_i32, %arg0 : i32, i32
  }
}

</mosaic_0001>

<bundles_post_ra>
// kernel: tpu_custom_call.1
= control target key start
LH: loop header
LB: loop body
LE: loop exit
PB: predicated region body
PF: predicated region fallthrough
CT: control target
= control target key end

     0   :  { %13 = vsyncpa [#allocation3], 0  ;;  %s3606_s0 = inlined_call_operand.hbm [shape: f32[16,16,128], index: 0, kind: input, shape index: {}]   ;;  %s3607_s1 = inlined_call_operand.vmem [shape: f32[1,256], index: 1, kind: input, shape index: {}]   ;;  %s3608_s2 = inlined_call_operand.vmem [shape: f32[1,128], index: 2, kind: input, shape index: {}]   ;;  %s3609_s3 = inlined_call_operand.vmem [shape: f32[1,128], index: 3, kind: input, shape index: {}]   ;;  %s3610_s4 = inlined_call_operand.hbm [shape: bf16[640,128], index: 4, kind: input, shape index: {}]   ;;  %s3611_s5 = inlined_call_operand.hbm [shape: bf16[128,256], index: 5, kind: output, shape index: {0}]   ;;  %s3612_s6 = inlined_call_operand.hbm [shape: bf16[128,256], index: 6, kind: output, shape index: {1}]   ;;  %s3613_s7 = inlined_call_operand.hbm [shape: bf16[128,256], index: 7, kind: output, shape index: {2}]  }
   0x1   :  { %14 = vsyncpa [#allocation6], 0 }
   0x2   :  { %15 = vsyncpa [#allocation4], 0 }
   0x3   :  { %16 = vsyncpa [#allocation9], 0  ;;  %s2996_s24 = smov [#allocation2]   ;;  %s2878_s28 = scalar_lea.hbm %s3606_s0, 4096 }
   0x4   :  { %s22_s25 = sshll.u32 %s2996_s24, 4  ;;  %p2879_p0 = scmp.ne.s32.totalorder %s3606_s0, %s2878_s28  ;;  %s23_s25 = int_to_ptr.vmem [resolvable:$true] %s22_s25 }
   0x5   :  { %p2882_p1 = scmp.lt.u32.totalorder %s2878_s28, %s3606_s0 }
   0x7   :  { %p2884_p2 = pnand %p2882_p1, %p2879_p0 }
   0x9   :  { %2887 = shalt.err (!%p2884_p2)
}
   0xa   :  { %s2888_s10 = scalar_lea.vmem %s23_s25, 4096  ;;  %p2893_p4 = scmp.lt.s32.totalorder %s23_s25, %s23_s25 }
   0xb   :  { %p2889_p3 = scmp.ne.s32.totalorder %s23_s25, %s2888_s10  ;;  %p2894_p5 = scmp.lt.s32.totalorder %s2888_s10, %s2888_s10 }
   0xd   :  { %p2895_p6 = por %p2894_p5, %p2893_p4 }
   0xf   :  { %p2896_p7 = pnand %p2895_p6, %p2889_p3 }
  0x11   :  { %2899 = shalt.err (!%p2896_p7)
}
  0x12   :  { %s2997_s11 = smov 128   ;;  %s2998_s12 = smov 8  }
  0x13   :  { %28 = dma.hbm_to_vmem [thread:$0]  %s3606_s0, 4096, %s23_s25, [#allocation3], %s2997_s11, %s2997_s11, %s2998_s12  }
  0x14   :  { %s2999_s15 = smov [#allocation5]   ;;  %s2900_s19 = scalar_lea.hbm %s3610_s4, 5120 }
  0x15   :  { %s40_s16 = sshll.u32 %s2999_s15, 4  ;;  %p2901_p8 = scmp.ne.s32.totalorder %s3610_s4, %s2900_s19  ;;  %s41_s16 = int_to_ptr.vmem [resolvable:$true] %s40_s16 }
  0x16   :  { %p2904_p9 = scmp.lt.u32.totalorder %s2900_s19, %s3610_s4 }
  0x18   :  { %p2906_p10 = pnand %p2904_p9, %p2901_p8 }
  0x1a   :  { %2909 = shalt.err (!%p2906_p10)
}
  0x1b   :  { %s2910_s24 = scalar_lea.vmem %s41_s16, 5120  ;;  %p2915_p12 = scmp.lt.s32.totalorder %s41_s16, %s41_s16 }
  0x1c   :  { %p2911_p11 = scmp.ne.s32.totalorder %s41_s16, %s2910_s24  ;;  %p2916_p13 = scmp.lt.s32.totalorder %s2910_s24, %s2910_s24 }
  0x1e   :  { %p2917_p0 = por %p2916_p13, %p2915_p12 }
  0x20   :  { %p2918_p1 = pnand %p2917_p0, %p2911_p11 }
  0x22   :  { %2921 = shalt.err (!%p2918_p1)
}
  0x23   :  { %s3000_s0 = smov 64   ;;  %s3001_s25 = smov 4  }
  0x24   :  { %46 = dma.hbm_to_vmem [thread:$0]  %s3610_s4, 5120, %s41_s16, [#allocation6], %s3000_s0, %s3000_s0, %s3001_s25  }
  0x25   :  { %2988 = dma.done.wait [#allocation3], 4096  }
  0x26   :  { %2989 = vsyncadd [#allocation3], 4294963200 }
  0x27   :  { %2990 = dma.done.wait [#allocation6], 5120  }
  0x28   :  { %2991 = vsyncadd [#allocation6], 4294962176  ;;  %v3072_v0 = vld [vmem:[#allocation2 + $0x80] sm:$0xff]  ;;  %v3078_v2 = vld [vmem:[#allocation2 + $0x88] sm:$0xff] }
  0x29   :  { %v3074_v1 = vld [vmem:[#allocation2] sm:$0xff]  ;;  %118 = vadd.xlane.f32.xlu0 %v3072_v0  ;;  %v3080_v3 = vld [vmem:[#allocation2 + $0x8] sm:$0xff]  ;;  %v3084_v4 = vld [vmem:[#allocation2 + $0x90] sm:$0xff] }
  0x2a   :  { %86 = vadd.xlane.f32.xlu1 %v3074_v1  ;;  %v3086_v5 = vld [vmem:[#allocation2 + $0x98] sm:$0xff]  ;;  %v3090_v6 = vld [vmem:[#allocation2 + $0x10] sm:$0xff]  ;;  %v3094_v8 = vld [vmem:[#allocation2 + $0xa0] sm:$0xff] }
  0x2b   :  { %v3092_v7 = vld [vmem:[#allocation2 + $0x18] sm:$0xff]  ;;  %v3096_v9 = vld [vmem:[#allocation2 + $0xa8] sm:$0xff]  ;;  %v3100_v10 = vld [vmem:[#allocation2 + $0x20] sm:$0xff] }
  0x2c   :  { %v3102_v11 = vld [vmem:[#allocation2 + $0x28] sm:$0xff]  ;;  %v3106_v12 = vld [vmem:[#allocation2 + $0xb0] sm:$0xff]  ;;  %v3108_v13 = vld [vmem:[#allocation2 + $0xb8] sm:$0xff] }
  0x2d   :  { %120 = vadd.xlane.f32.xlu0 %v3078_v2  ;;  %v3112_v14 = vld [vmem:[#allocation2 + $0x30] sm:$0xff]  ;;  %v3114_v15 = vld [vmem:[#allocation2 + $0x38] sm:$0xff]  ;;  %v3118_v16 = vld [vmem:[#allocation2 + $0xc0] sm:$0xff] }
  0x2e   :  { %88 = vadd.xlane.f32.xlu1 %v3080_v3  ;;  %v3120_v17 = vld [vmem:[#allocation2 + $0xc8] sm:$0xff]  ;;  %v3124_v18 = vld [vmem:[#allocation2 + $0x40] sm:$0xff]  ;;  %v3132_v20 = vld [vmem:[#allocation2 + $0xd0] sm:$0xff] }
  0x2f   :  { %v3126_v19 = vld [vmem:[#allocation2 + $0x48] sm:$0xff]  ;;  %v3134_v21 = vld [vmem:[#allocation2 + $0xd8] sm:$0xff]  ;;  %v3138_v22 = vld [vmem:[#allocation2 + $0x50] sm:$0xff] }
  0x30   :  { %v3140_v23 = vld [vmem:[#allocation2 + $0x58] sm:$0xff]  ;;  %v3144_v24 = vld [vmem:[#allocation2 + $0xe0] sm:$0xff]  ;;  %v3146_v25 = vld [vmem:[#allocation2 + $0xe8] sm:$0xff] }
  0x31   :  { %122 = vadd.xlane.f32.xlu0 %v3084_v4  ;;  %v3150_v26 = vld [vmem:[#allocation2 + $0x60] sm:$0xff]  ;;  %v3152_v27 = vld [vmem:[#allocation2 + $0x68] sm:$0xff]  ;;  %v3156_v28 = vld [vmem:[#allocation2 + $0xf0] sm:$0xff] }
  0x32   :  { %124 = vadd.xlane.f32.xlu1 %v3086_v5  ;;  %v3158_v29 = vld [vmem:[#allocation2 + $0xf8] sm:$0xff]  ;;  %v3162_v30 = vld [vmem:[#allocation2 + $0x70] sm:$0xff] }
  0x33   :  { %v3164_v31 = vld [vmem:[#allocation2 + $0x78] sm:$0xff] }
  0x35   :  { %90 = vadd.xlane.f32.xlu0 %v3090_v6 }
  0x36   :  { %92 = vadd.xlane.f32.xlu1 %v3092_v7 }
  0x39   :  { %126 = vadd.xlane.f32.xlu0 %v3094_v8 }
  0x3a   :  { %128 = vadd.xlane.f32.xlu1 %v3096_v9 }
  0x3d   :  { %94 = vadd.xlane.f32.xlu0 %v3100_v10 }
  0x3e   :  { %96 = vadd.xlane.f32.xlu1 %v3102_v11 }
  0x41   :  { %130 = vadd.xlane.f32.xlu0 %v3106_v12 }
  0x42   :  { %132 = vadd.xlane.f32.xlu1 %v3108_v13 }
  0x45   :  { %98 = vadd.xlane.f32.xlu0 %v3112_v14 }
  0x46   :  { %100 = vadd.xlane.f32.xlu1 %v3114_v15 }
  0x49   :  { %134 = vadd.xlane.f32.xlu0 %v3118_v16 }
  0x4a   :  { %136 = vadd.xlane.f32.xlu1 %v3120_v17 }
  0x4d   :  { %102 = vadd.xlane.f32.xlu0 %v3124_v18 }
  0x4e   :  { %104 = vadd.xlane.f32.xlu1 %v3126_v19 }
  0x51   :  { %138 = vadd.xlane.f32.xlu0 %v3132_v20 }
  0x52   :  { %140 = vadd.xlane.f32.xlu1 %v3134_v21 }
  0x55   :  { %106 = vadd.xlane.f32.xlu0 %v3138_v22 }
  0x56   :  { %108 = vadd.xlane.f32.xlu1 %v3140_v23 }
  0x59   :  { %142 = vadd.xlane.f32.xlu0 %v3144_v24 }
  0x5a   :  { %144 = vadd.xlane.f32.xlu1 %v3146_v25 }
  0x5d   :  { %110 = vadd.xlane.f32.xlu0 %v3150_v26 }
  0x5e   :  { %112 = vadd.xlane.f32.xlu1 %v3152_v27 }
  0x61   :  { %146 = vadd.xlane.f32.xlu0 %v3156_v28 }
  0x62   :  { %148 = vadd.xlane.f32.xlu1 %v3158_v29 }
  0x65   :  { %114 = vadd.xlane.f32.xlu0 %v3162_v30 }
  0x66   :  { %116 = vadd.xlane.f32.xlu1 %v3164_v31 }
  0xb6   :  { %v119_v32 = vpop.xlane.xlu0 %118 }
  0xb7   :  { %v87_v33 = vpop.xlane.xlu1 %86  ;;  %v167_v34 = vmul.f32 0.0078125, %v119_v32 }
  0xb8   :  { %v151_v35 = vmul.f32 0.0078125, %v87_v33 }
  0xb9   :  { %v3169_v36 = vsub.f32 %v3072_v0, %v167_v34 }
  0xba   :  { %v3172_v37 = vsub.f32 %v3074_v1, %v151_v35  ;;  %v121_v38 = vpop.xlane.xlu0 %120 }
  0xbb   :  { %v89_v39 = vpop.xlane.xlu1 %88  ;;  %v168_v40 = vmul.f32 0.0078125, %v121_v38  ;;  %v231_v41 = vmul.f32 %v3169_v36, %v3169_v36 }
  0xbc   :  { %v152_v42 = vmul.f32 0.0078125, %v89_v39  ;;  %v215_v45 = vmul.f32 %v3172_v37, %v3172_v37 }
  0xbd   :  { %v3177_v43 = vsub.f32 %v3078_v2, %v168_v40  ;;  %279 = vadd.xlane.f32.xlu0 %v231_v41 }
  0xbe   :  { %v3180_v44 = vsub.f32 %v3080_v3, %v152_v42  ;;  %v123_v46 = vpop.xlane.xlu0 %122 }
  0xbf   :  { %v125_v47 = vpop.xlane.xlu1 %124  ;;  %v169_v48 = vmul.f32 0.0078125, %v123_v46  ;;  %v232_v49 = vmul.f32 %v3177_v43, %v3177_v43 }
  0xc0   :  { %v170_v50 = vmul.f32 0.0078125, %v125_v47  ;;  %v216_v53 = vmul.f32 %v3180_v44, %v3180_v44 }
  0xc1   :  { %v3187_v51 = vsub.f32 %v3084_v4, %v169_v48  ;;  %281 = vadd.xlane.f32.xlu1 %v232_v49  ;;  %247 = vadd.xlane.f32.xlu0 %v215_v45 }
  0xc2   :  { %v3190_v52 = vsub.f32 %v3086_v5, %v170_v50  ;;  %v91_v54 = vpop.xlane.xlu0 %90 }
  0xc3   :  { %v93_v55 = vpop.xlane.xlu1 %92  ;;  %v153_v56 = vmul.f32 0.0078125, %v91_v54  ;;  %v233_v57 = vmul.f32 %v3187_v51, %v3187_v51 }
  0xc4   :  { %v154_v58 = vmul.f32 0.0078125, %v93_v55  ;;  %v234_v61 = vmul.f32 %v3190_v52, %v3190_v52 }
  0xc5   :  { %v3197_v59 = vsub.f32 %v3090_v6, %v153_v56  ;;  %283 = vadd.xlane.f32.xlu0 %v233_v57  ;;  %249 = vadd.xlane.f32.xlu1 %v216_v53 }
  0xc6   :  { %v3200_v60 = vsub.f32 %v3092_v7, %v154_v58  ;;  %v127_v62 = vpop.xlane.xlu0 %126 }
  0xc7   :  { %v129_v63 = vpop.xlane.xlu1 %128  ;;  %v171_v0 = vmul.f32 0.0078125, %v127_v62  ;;  %v217_v1 = vmul.f32 %v3197_v59, %v3197_v59 }
  0xc8   :  { %v172_v2 = vmul.f32 0.0078125, %v129_v63  ;;  %v218_v5 = vmul.f32 %v3200_v60, %v3200_v60 }
  0xc9   :  { %v3207_v3 = vsub.f32 %v3094_v8, %v171_v0  ;;  %251 = vadd.xlane.f32.xlu0 %v217_v1  ;;  %285 = vadd.xlane.f32.xlu1 %v234_v61 }
  0xca   :  { %v3210_v4 = vsub.f32 %v3096_v9, %v172_v2  ;;  %v95_v6 = vpop.xlane.xlu0 %94 }
  0xcb   :  { %v97_v7 = vpop.xlane.xlu1 %96  ;;  %v155_v32 = vmul.f32 0.0078125, %v95_v6  ;;  %v235_v33 = vmul.f32 %v3207_v3, %v3207_v3 }
  0xcc   :  { %v156_v34 = vmul.f32 0.0078125, %v97_v7  ;;  %v236_v9 = vmul.f32 %v3210_v4, %v3210_v4 }
  0xcd   :  { %v3217_v35 = vsub.f32 %v3100_v10, %v155_v32  ;;  %287 = vadd.xlane.f32.xlu0 %v235_v33  ;;  %253 = vadd.xlane.f32.xlu1 %v218_v5 }
  0xce   :  { %v3220_v8 = vsub.f32 %v3102_v11, %v156_v34  ;;  %v131_v38 = vpop.xlane.xlu0 %130 }
  0xcf   :  { %v133_v39 = vpop.xlane.xlu1 %132  ;;  %v173_v40 = vmul.f32 0.0078125, %v131_v38  ;;  %v219_v41 = vmul.f32 %v3217_v35, %v3217_v35 }
  0xd0   :  { %v174_v42 = vmul.f32 0.0078125, %v133_v39  ;;  %v220_v11 = vmul.f32 %v3220_v8, %v3220_v8 }
  0xd1   :  { %v3227_v45 = vsub.f32 %v3106_v12, %v173_v40  ;;  %255 = vadd.xlane.f32.xlu0 %v219_v41  ;;  %289 = vadd.xlane.f32.xlu1 %v236_v9 }
  0xd2   :  { %v3230_v10 = vsub.f32 %v3108_v13, %v174_v42  ;;  %v99_v46 = vpop.xlane.xlu0 %98 }
  0xd3   :  { %v101_v47 = vpop.xlane.xlu1 %100  ;;  %v157_v48 = vmul.f32 0.0078125, %v99_v46  ;;  %v237_v49 = vmul.f32 %v3227_v45, %v3227_v45 }
  0xd4   :  { %v158_v50 = vmul.f32 0.0078125, %v101_v47  ;;  %v238_v13 = vmul.f32 %v3230_v10, %v3230_v10 }
  0xd5   :  { %v3237_v53 = vsub.f32 %v3112_v14, %v157_v48  ;;  %291 = vadd.xlane.f32.xlu0 %v237_v49  ;;  %257 = vadd.xlane.f32.xlu1 %v220_v11 }
  0xd6   :  { %v3240_v12 = vsub.f32 %v3114_v15, %v158_v50  ;;  %v135_v54 = vpop.xlane.xlu0 %134 }
  0xd7   :  { %v137_v55 = vpop.xlane.xlu1 %136  ;;  %v175_v56 = vmul.f32 0.0078125, %v135_v54  ;;  %v221_v57 = vmul.f32 %v3237_v53, %v3237_v53 }
  0xd8   :  { %v176_v58 = vmul.f32 0.0078125, %v137_v55  ;;  %v222_v15 = vmul.f32 %v3240_v12, %v3240_v12 }
  0xd9   :  { %v3247_v61 = vsub.f32 %v3118_v16, %v175_v56  ;;  %259 = vadd.xlane.f32.xlu0 %v221_v57  ;;  %293 = vadd.xlane.f32.xlu1 %v238_v13 }
  0xda   :  { %v3250_v14 = vsub.f32 %v3120_v17, %v176_v58  ;;  %v103_v62 = vpop.xlane.xlu0 %102 }
  0xdb   :  { %v105_v63 = vpop.xlane.xlu1 %104  ;;  %v159_v0 = vmul.f32 0.0078125, %v103_v62  ;;  %v239_v1 = vmul.f32 %v3247_v61, %v3247_v61 }
  0xdc   :  { %v160_v2 = vmul.f32 0.0078125, %v105_v63  ;;  %v240_v17 = vmul.f32 %v3250_v14, %v3250_v14 }
  0xdd   :  { %v3257_v5 = vsub.f32 %v3124_v18, %v159_v0  ;;  %295 = vadd.xlane.f32.xlu0 %v239_v1  ;;  %261 = vadd.xlane.f32.xlu1 %v222_v15 }
  0xde   :  { %v3260_v16 = vsub.f32 %v3126_v19, %v160_v2  ;;  %v139_v6 = vpop.xlane.xlu0 %138 }
  0xdf   :  { %v141_v7 = vpop.xlane.xlu1 %140  ;;  %v177_v32 = vmul.f32 0.0078125, %v139_v6  ;;  %v223_v33 = vmul.f32 %v3257_v5, %v3257_v5 }
  0xe0   :  { %v178_v34 = vmul.f32 0.0078125, %v141_v7  ;;  %v224_v19 = vmul.f32 %v3260_v16, %v3260_v16 }
  0xe1   :  { %v3267_v9 = vsub.f32 %v3132_v20, %v177_v32  ;;  %263 = vadd.xlane.f32.xlu0 %v223_v33  ;;  %297 = vadd.xlane.f32.xlu1 %v240_v17 }
  0xe2   :  { %v3270_v18 = vsub.f32 %v3134_v21, %v178_v34  ;;  %v107_v38 = vpop.xlane.xlu0 %106 }
  0xe3   :  { %v109_v39 = vpop.xlane.xlu1 %108  ;;  %v161_v40 = vmul.f32 0.0078125, %v107_v38  ;;  %v241_v41 = vmul.f32 %v3267_v9, %v3267_v9 }
  0xe4   :  { %v162_v42 = vmul.f32 0.0078125, %v109_v39  ;;  %v242_v21 = vmul.f32 %v3270_v18, %v3270_v18 }
  0xe5   :  { %v3277_v11 = vsub.f32 %v3138_v22, %v161_v40  ;;  %299 = vadd.xlane.f32.xlu0 %v241_v41  ;;  %265 = vadd.xlane.f32.xlu1 %v224_v19  ;;  %v3328_v40 = vld [vmem:[#allocation5] sm:$0xff]  }
  0xe6   :  { %v3280_v20 = vsub.f32 %v3140_v23, %v162_v42  ;;  %v143_v46 = vpop.xlane.xlu0 %142  ;;  %2413 = vmatprep.mubr.bf16.mxu0 %v3328_v40 }
  0xe7   :  { %v145_v47 = vpop.xlane.xlu1 %144  ;;  %v179_v48 = vmul.f32 0.0078125, %v143_v46  ;;  %v225_v49 = vmul.f32 %v3277_v11, %v3277_v11 }
  0xe8   :  { %v180_v50 = vmul.f32 0.0078125, %v145_v47  ;;  %v226_v23 = vmul.f32 %v3280_v20, %v3280_v20 }
  0xe9   :  { %v3287_v13 = vsub.f32 %v3144_v24, %v179_v48  ;;  %267 = vadd.xlane.f32.xlu0 %v225_v49  ;;  %301 = vadd.xlane.f32.xlu1 %v242_v21 }
  0xea   :  { %v3290_v22 = vsub.f32 %v3146_v25, %v180_v50  ;;  %v111_v54 = vpop.xlane.xlu0 %110 }
  0xeb   :  { %v113_v55 = vpop.xlane.xlu1 %112  ;;  %v163_v56 = vmul.f32 0.0078125, %v111_v54  ;;  %v243_v57 = vmul.f32 %v3287_v13, %v3287_v13 }
  0xec   :  { %v164_v58 = vmul.f32 0.0078125, %v113_v55  ;;  %v244_v25 = vmul.f32 %v3290_v22, %v3290_v22 }
  0xed   :  { %v3297_v15 = vsub.f32 %v3150_v26, %v163_v56  ;;  %303 = vadd.xlane.f32.xlu0 %v243_v57  ;;  %269 = vadd.xlane.f32.xlu1 %v226_v23 }
  0xee   :  { %v3300_v24 = vsub.f32 %v3152_v27, %v164_v58  ;;  %v147_v62 = vpop.xlane.xlu0 %146 }
  0xef   :  { %v149_v63 = vpop.xlane.xlu1 %148  ;;  %v181_v0 = vmul.f32 0.0078125, %v147_v62  ;;  %v227_v1 = vmul.f32 %v3297_v15, %v3297_v15 }
  0xf0   :  { %v182_v2 = vmul.f32 0.0078125, %v149_v63  ;;  %v228_v27 = vmul.f32 %v3300_v24, %v3300_v24 }
  0xf1   :  { %v3307_v17 = vsub.f32 %v3156_v28, %v181_v0  ;;  %271 = vadd.xlane.f32.xlu0 %v227_v1  ;;  %305 = vadd.xlane.f32.xlu1 %v244_v25 }
  0xf2   :  { %v3310_v26 = vsub.f32 %v3158_v29, %v182_v2  ;;  %v115_v6 = vpop.xlane.xlu0 %114 }
  0xf3   :  { %v117_v7 = vpop.xlane.xlu1 %116  ;;  %v165_v32 = vmul.f32 0.0078125, %v115_v6  ;;  %v245_v33 = vmul.f32 %v3307_v17, %v3307_v17 }
  0xf4   :  { %v166_v34 = vmul.f32 0.0078125, %v117_v7  ;;  %v246_v29 = vmul.f32 %v3310_v26, %v3310_v26 }
  0xf5   :  { %v3317_v19 = vsub.f32 %v3162_v30, %v165_v32  ;;  %307 = vadd.xlane.f32.xlu0 %v245_v33  ;;  %273 = vadd.xlane.f32.xlu1 %v228_v27  ;;  %v3331_v30 = vld [vmem:[#allocation5 + $0xa0] sm:$0xff]  }
  0xf6   :  { %v3320_v28 = vsub.f32 %v3164_v31, %v166_v34  ;;  %2453 = vmatprep.mubr.bf16.mxu1 %v3331_v30 }
  0xf7   :  { %v229_v38 = vmul.f32 %v3317_v19, %v3317_v19 }
  0xf8   :  { %v230_v39 = vmul.f32 %v3320_v28, %v3320_v28 }
  0xf9   :  { %275 = vadd.xlane.f32.xlu0 %v229_v38  ;;  %309 = vadd.xlane.f32.xlu1 %v246_v29  ;;  %v3338_v29 = vld [vmem:[%s3608_s2] ss:$0 sm:$0xff] }
  0xfd   :  { %277 = vadd.xlane.f32.xlu1 %v230_v39 }
 0x14a   :  { %v280_v31 = vpop.xlane.xlu0 %279 }
 0x14b   :  { %v327_v41 = vmul.f32 0.0078125, %v280_v31 }
 0x14d   :  { %v359_v42 = vadd.f32 1e-05, %v327_v41 }
 0x14e   :  { %v248_v21 = vpop.xlane.xlu0 %247  ;;  %v282_v46 = vpop.xlane.xlu1 %281 }
 0x14f   :  { %2558 = vrsqrt.f32 %v359_v42  ;;  %v311_v47 = vmul.f32 0.0078125, %v248_v21  ;;  %v328_v48 = vmul.f32 0.0078125, %v282_v46 }
 0x151   :  { %v343_v49 = vadd.f32 1e-05, %v311_v47  ;;  %v360_v50 = vadd.f32 1e-05, %v328_v48 }
 0x152   :  { %v284_v23 = vpop.xlane.xlu0 %283  ;;  %v250_v54 = vpop.xlane.xlu1 %249 }
 0x153   :  { %2560 = vrsqrt.f32 %v343_v49  ;;  %v329_v55 = vmul.f32 0.0078125, %v284_v23  ;;  %v312_v56 = vmul.f32 0.0078125, %v250_v54  ;;  %v3345_v49 = vld [vmem:[%s3609_s3] ss:$0 sm:$0xff] }
 0x154   :  { %2562 = vrsqrt.f32 %v360_v50 }
 0x155   :  { %v361_v57 = vadd.f32 1e-05, %v329_v55  ;;  %v344_v58 = vadd.f32 1e-05, %v312_v56 }
 0x156   :  { %v252_v25 = vpop.xlane.xlu0 %251  ;;  %v286_v62 = vpop.xlane.xlu1 %285 }
 0x157   :  { %2564 = vrsqrt.f32 %v361_v57  ;;  %v313_v63 = vmul.f32 0.0078125, %v252_v25  ;;  %v330_v0 = vmul.f32 0.0078125, %v286_v62 }
 0x158   :  { %2566 = vrsqrt.f32 %v344_v58 }
 0x159   :  { %v2559_v1 = vpop.eup %2558  ;;  %v345_v2 = vadd.f32 1e-05, %v313_v63  ;;  %v362_v27 = vadd.f32 1e-05, %v330_v0 }
 0x15a   :  { %v288_v6 = vpop.xlane.xlu0 %287  ;;  %v254_v7 = vpop.xlane.xlu1 %253  ;;  %v423_v32 = vmul.f32 %v2559_v1, %v3169_v36 }
 0x15b   :  { %2568 = vrsqrt.f32 %v345_v2  ;;  %v331_v33 = vmul.f32 0.0078125, %v288_v6  ;;  %v314_v34 = vmul.f32 0.0078125, %v254_v7 }
 0x15c   :  { %2570 = vrsqrt.f32 %v362_v27  ;;  %v462_v46 = vmul.f32 %v3338_v29, %v423_v32 }
 0x15d   :  { %v2561_v38 = vpop.eup %2560  ;;  %v363_v39 = vadd.f32 1e-05, %v331_v33  ;;  %v346_v31 = vadd.f32 1e-05, %v314_v34 }
 0x15e   :  { %v2563_v41 = vpop.eup %2562  ;;  %v256_v42 = vpop.xlane.xlu0 %255  ;;  %v407_v50 = vmul.f32 %v2561_v38, %v3172_v37  ;;  %v501_v62 = vadd.f32 %v3345_v49, %v462_v46 }
 0x15f   :  { %v290_v21 = vpop.xlane.xlu1 %289  ;;  %2572 = vrsqrt.f32 %v363_v39  ;;  %v315_v47 = vmul.f32 0.0078125, %v256_v42  ;;  %v424_v48 = vmul.f32 %v2563_v41, %v3177_v43 }
 0x160   :  { %v332_v36 = vmul.f32 0.0078125, %v290_v21  ;;  %2574 = vrsqrt.f32 %v346_v31  ;;  %v446_v2 = vmul.f32 %v3338_v29, %v407_v50 }
 0x161   :  { %v2565_v23 = vpop.eup %2564  ;;  %v347_v54 = vadd.f32 1e-05, %v315_v47  ;;  %v463_v56 = vmul.f32 %v3338_v29, %v424_v48 }
 0x162   :  { %v364_v55 = vadd.f32 1e-05, %v332_v36  ;;  %v2567_v57 = vpop.eup %2566  ;;  %v292_v58 = vpop.xlane.xlu0 %291  ;;  %v425_v43 = vmul.f32 %v2565_v23, %v3187_v51  ;;  %v485_v42 = vadd.f32 %v3345_v49, %v446_v2 }
 0x163   :  { %v258_v25 = vpop.xlane.xlu1 %257  ;;  %2576 = vrsqrt.f32 %v347_v54  ;;  %v333_v63 = vmul.f32 0.0078125, %v292_v58  ;;  %v502_v1 = vadd.f32 %v3345_v49, %v463_v56  ;;  %v408_v37 = vmul.f32 %v2567_v57, %v3180_v44 }
 0x164   :  { %v316_v0 = vmul.f32 0.0078125, %v258_v25  ;;  %2578 = vrsqrt.f32 %v364_v55  ;;  %v464_v51 = vmul.f32 %v3338_v29, %v425_v43 }
 0x165   :  { %v2569_v27 = vpop.eup %2568  ;;  %v365_v6 = vadd.f32 1e-05, %v333_v63  ;;  %v525_v32 = vpack.c.bf16 %v502_v1, %v501_v62  ;;  %v447_v39 = vmul.f32 %v3338_v29, %v408_v37 }
 0x166   :  { %v348_v7 = vadd.f32 1e-05, %v316_v0  ;;  %v2571_v33 = vpop.eup %2570  ;;  %v260_v34 = vpop.xlane.xlu0 %259  ;;  %v409_v46 = vmul.f32 %v2569_v27, %v3197_v59  ;;  %v503_v57 = vadd.f32 %v3345_v49, %v464_v51 }
 0x167   :  { %v294_v38 = vpop.xlane.xlu1 %293  ;;  %2580 = vrsqrt.f32 %v365_v6  ;;  %v317_v31 = vmul.f32 0.0078125, %v260_v34  ;;  %2397 = vmatprep.subr.bf16.mxu0 %v525_v32  ;;  %2493 = vmatprep.subr.bf16.mxu1 %v525_v32  ;;  %v426_v44 = vmul.f32 %v2571_v33, %v3190_v52  ;;  %v486_v21 = vadd.f32 %v3345_v49, %v447_v39 }
 0x168   :  { %v334_v41 = vmul.f32 0.0078125, %v294_v38  ;;  %2582 = vrsqrt.f32 %v348_v7  ;;  %v448_v43 = vmul.f32 %v3338_v29, %v409_v46 }
 0x169   :  { %v2573_v47 = vpop.eup %2572  ;;  %v349_v36 = vadd.f32 1e-05, %v317_v31  ;;  %v465_v50 = vmul.f32 %v3338_v29, %v426_v44  ;;  %v517_v55 = vpack.c.bf16 %v486_v21, %v485_v42 }
 0x16a   :  { %v366_v48 = vadd.f32 1e-05, %v334_v41  ;;  %v2575_v23 = vpop.eup %2574  ;;  %v296_v54 = vpop.xlane.xlu0 %295  ;;  %v427_v52 = vmul.f32 %v2573_v47, %v3207_v3  ;;  %v487_v34 = vadd.f32 %v3345_v49, %v448_v43 }
 0x16b   :  { %v262_v56 = vpop.xlane.xlu1 %261  ;;  %2584 = vrsqrt.f32 %v349_v36  ;;  %v335_v58 = vmul.f32 0.0078125, %v296_v54  ;;  %v504_v62 = vadd.f32 %v3345_v49, %v465_v50  ;;  %2398 = vmatpush3.bf16.xpose.msra.mxu0 %v517_v55  ;;  %2501 = vmatpush3.bf16.xpose.msra.mxu1 %v517_v55  ;;  %v410_v59 = vmul.f32 %v2575_v23, %v3200_v60 }
 0x16c   :  { %v318_v25 = vmul.f32 0.0078125, %v262_v56  ;;  %2586 = vrsqrt.f32 %v366_v48  ;;  %v466_v7 = vmul.f32 %v3338_v29, %v427_v52 }
 0x16d   :  { %v2577_v63 = vpop.eup %2576  ;;  %v367_v0 = vadd.f32 1e-05, %v335_v58  ;;  %v526_v37 = vpack.c.bf16 %v504_v62, %v503_v57  ;;  %v449_v3 = vmul.f32 %v3338_v29, %v410_v59 }
 0x16e   :  { %v350_v1 = vadd.f32 1e-05, %v318_v25  ;;  %v2579_v2 = vpop.eup %2578  ;;  %v264_v27 = vpop.xlane.xlu0 %263  ;;  %v411_v39 = vmul.f32 %v2577_v63, %v3217_v35  ;;  %v505_v36 = vadd.f32 %v3345_v49, %v466_v7 }
 0x16f   :  { %v298_v6 = vpop.xlane.xlu1 %297  ;;  %2588 = vrsqrt.f32 %v367_v0  ;;  %v319_v32 = vmul.f32 0.0078125, %v264_v27  ;;  %2399 = vmatprep.subr.bf16.mxu0 %v526_v37  ;;  %2494 = vmatprep.subr.bf16.mxu1 %v526_v37  ;;  %v428_v60 = vmul.f32 %v2579_v2, %v3210_v4  ;;  %v488_v38 = vadd.f32 %v3345_v49, %v449_v3 }
 0x170   :  { %v336_v33 = vmul.f32 0.0078125, %v298_v6  ;;  %2590 = vrsqrt.f32 %v350_v1  ;;  %v450_v54 = vmul.f32 %v3338_v29, %v411_v39 }
 0x171   :  { %v2581_v51 = vpop.eup %2580  ;;  %v351_v31 = vadd.f32 1e-05, %v319_v32  ;;  %v467_v44 = vmul.f32 %v3338_v29, %v428_v60  ;;  %v518_v46 = vpack.c.bf16 %v488_v38, %v487_v34 }
 0x172   :  { %v368_v41 = vadd.f32 1e-05, %v336_v33  ;;  %v2583_v42 = vpop.eup %2582  ;;  %v300_v21 = vpop.xlane.xlu0 %299  ;;  %v429_v4 = vmul.f32 %v2581_v51, %v3227_v45  ;;  %v489_v0 = vadd.f32 %v3345_v49, %v450_v54 }
 0x173   :  { %v266_v47 = vpop.xlane.xlu1 %265  ;;  %2592 = vrsqrt.f32 %v351_v31  ;;  %v337_v48 = vmul.f32 0.0078125, %v300_v21  ;;  %v506_v23 = vadd.f32 %v3345_v49, %v467_v44  ;;  %2400 = vmatpush3.bf16.xpose.msra.mxu0 %v518_v46  ;;  %2502 = vmatpush3.bf16.xpose.msra.mxu1 %v518_v46  ;;  %v412_v35 = vmul.f32 %v2583_v42, %v3220_v8 }
 0x174   :  { %v320_v50 = vmul.f32 0.0078125, %v266_v47  ;;  %2594 = vrsqrt.f32 %v368_v41  ;;  %v468_v59 = vmul.f32 %v3338_v29, %v429_v4 }
 0x175   :  { %v2585_v55 = vpop.eup %2584  ;;  %v369_v56 = vadd.f32 1e-05, %v337_v48  ;;  %v527_v52 = vpack.c.bf16 %v506_v23, %v505_v36  ;;  %v451_v45 = vmul.f32 %v3338_v29, %v412_v35 }
 0x176   :  { %v352_v57 = vadd.f32 1e-05, %v320_v50  ;;  %v2587_v58 = vpop.eup %2586  ;;  %v268_v25 = vpop.xlane.xlu0 %267  ;;  %v413_v37 = vmul.f32 %v2585_v55, %v3237_v53  ;;  %v507_v34 = vadd.f32 %v3345_v49, %v468_v59 }
 0x177   :  { %v302_v62 = vpop.xlane.xlu1 %301  ;;  %2596 = vrsqrt.f32 %v369_v56  ;;  %v321_v43 = vmul.f32 0.0078125, %v268_v25  ;;  %2401 = vmatprep.subr.bf16.mxu0 %v527_v52  ;;  %2495 = vmatprep.subr.bf16.mxu1 %v527_v52  ;;  %v430_v8 = vmul.f32 %v2587_v58, %v3230_v10  ;;  %v490_v1 = vadd.f32 %v3345_v49, %v451_v45 }
 0x178   :  { %v338_v63 = vmul.f32 0.0078125, %v302_v62  ;;  %2598 = vrsqrt.f32 %v352_v57  ;;  %v452_v31 = vmul.f32 %v3338_v29, %v413_v37 }
 0x179   :  { %v2589_v2 = vpop.eup %2588  ;;  %v353_v27 = vadd.f32 1e-05, %v321_v43  ;;  %v469_v3 = vmul.f32 %v3338_v29, %v430_v8  ;;  %v519_v33 = vpack.c.bf16 %v490_v1, %v489_v0 }
 0x17a   :  { %v370_v6 = vadd.f32 1e-05, %v338_v63  ;;  %v2591_v7 = vpop.eup %2590  ;;  %v304_v32 = vpop.xlane.xlu0 %303  ;;  %v431_v10 = vmul.f32 %v2589_v2, %v3247_v61  ;;  %v491_v23 = vadd.f32 %v3345_v49, %v452_v31 }
 0x17b   :  { %v270_v60 = vpop.xlane.xlu1 %269  ;;  %2600 = vrsqrt.f32 %v353_v27  ;;  %v339_v38 = vmul.f32 0.0078125, %v304_v32  ;;  %v508_v51 = vadd.f32 %v3345_v49, %v469_v3  ;;  %2402 = vmatpush3.bf16.xpose.msra.mxu0 %v519_v33  ;;  %2503 = vmatpush3.bf16.xpose.msra.mxu1 %v519_v33  ;;  %v414_v53 = vmul.f32 %v2591_v7, %v3240_v12 }
 0x17c   :  { %v322_v39 = vmul.f32 0.0078125, %v270_v60  ;;  %2602 = vrsqrt.f32 %v370_v6  ;;  %v470_v4 = vmul.f32 %v3338_v29, %v431_v10 }
 0x17d   :  { %v2593_v41 = vpop.eup %2592  ;;  %v371_v44 = vadd.f32 1e-05, %v339_v38  ;;  %v528_v21 = vpack.c.bf16 %v508_v51, %v507_v34  ;;  %v453_v61 = vmul.f32 %v3338_v29, %v414_v53 }
 0x17e   :  { %v354_v42 = vadd.f32 1e-05, %v322_v39  ;;  %v2595_v46 = vpop.eup %2594  ;;  %v272_v47 = vpop.xlane.xlu0 %271  ;;  %v415_v54 = vmul.f32 %v2593_v41, %v3257_v5  ;;  %v509_v59 = vadd.f32 %v3345_v49, %v470_v4 }
 0x17f   :  { %v306_v36 = vpop.xlane.xlu1 %305  ;;  %2604 = vrsqrt.f32 %v371_v44  ;;  %v323_v48 = vmul.f32 0.0078125, %v272_v47  ;;  %2403 = vmatprep.subr.bf16.mxu0 %v528_v21  ;;  %2496 = vmatprep.subr.bf16.mxu1 %v528_v21  ;;  %v432_v12 = vmul.f32 %v2595_v46, %v3250_v14  ;;  %v492_v35 = vadd.f32 %v3345_v49, %v453_v61 }
 0x180   :  { %v340_v50 = vmul.f32 0.0078125, %v306_v36  ;;  %2606 = vrsqrt.f32 %v354_v42  ;;  %v454_v0 = vmul.f32 %v3338_v29, %v415_v54 }
 0x181   :  { %v2597_v55 = vpop.eup %2596  ;;  %v355_v56 = vadd.f32 1e-05, %v323_v48  ;;  %v471_v52 = vmul.f32 %v3338_v29, %v432_v12  ;;  %v520_v62 = vpack.c.bf16 %v492_v35, %v491_v23 }
 0x182   :  { %v372_v57 = vadd.f32 1e-05, %v340_v50  ;;  %v2599_v58 = vpop.eup %2598  ;;  %v308_v25 = vpop.xlane.xlu0 %307  ;;  %v433_v14 = vmul.f32 %v2597_v55, %v3267_v9  ;;  %v493_v10 = vadd.f32 %v3345_v49, %v454_v0 }
 0x183   :  { %v274_v45 = vpop.xlane.xlu1 %273  ;;  %2608 = vrsqrt.f32 %v355_v56  ;;  %v341_v43 = vmul.f32 0.0078125, %v308_v25  ;;  %v510_v8 = vadd.f32 %v3345_v49, %v471_v52  ;;  %2404 = vmatpush3.bf16.xpose.msra.mxu0 %v520_v62  ;;  %2504 = vmatpush3.bf16.xpose.msra.mxu1 %v520_v62  ;;  %v416_v5 = vmul.f32 %v2599_v58, %v3260_v16 }
 0x184   :  { %v324_v63 = vmul.f32 0.0078125, %v274_v45  ;;  %2610 = vrsqrt.f32 %v372_v57  ;;  %v472_v32 = vmul.f32 %v3338_v29, %v433_v14 }
 0x185   :  { %v2601_v1 = vpop.eup %2600  ;;  %v373_v37 = vadd.f32 1e-05, %v341_v43  ;;  %v529_v27 = vpack.c.bf16 %v510_v8, %v509_v59  ;;  %v455_v9 = vmul.f32 %v3338_v29, %v416_v5 }
 0x186   :  { %v356_v2 = vadd.f32 1e-05, %v324_v63  ;;  %v2603_v6 = vpop.eup %2602  ;;  %v276_v3 = vpop.xlane.xlu0 %275  ;;  %v417_v33 = vmul.f32 %v2601_v1, %v3277_v11  ;;  %v511_v42 = vadd.f32 %v3345_v49, %v472_v32 }
 0x187   :  { %v310_v7 = vpop.xlane.xlu1 %309  ;;  %2612 = vrsqrt.f32 %v373_v37  ;;  %v325_v60 = vmul.f32 0.0078125, %v276_v3  ;;  %2405 = vmatprep.subr.bf16.mxu0 %v529_v27  ;;  %2497 = vmatprep.subr.bf16.mxu1 %v529_v27  ;;  %v434_v34 = vmul.f32 %v2603_v6, %v3270_v18  ;;  %v494_v38 = vadd.f32 %v3345_v49, %v455_v9 }
 0x188   :  { %v342_v16 = vmul.f32 0.0078125, %v310_v7  ;;  %2614 = vrsqrt.f32 %v356_v2  ;;  %v456_v21 = vmul.f32 %v3338_v29, %v417_v33  ;;  %v2522_v33 = vld [vmem:[#allocation5 + $0xa8] sm:$0xff]  }
 0x189   :  { %v2605_v39 = vpop.eup %2604  ;;  %v357_v51 = vadd.f32 1e-05, %v325_v60  ;;  %v473_v31 = vmul.f32 %v3338_v29, %v434_v34  ;;  %v521_v44 = vpack.c.bf16 %v494_v38, %v493_v10  ;;  %v2521_v60 = vld [vmem:[#allocation5 + $0x10] sm:$0xff]   ;;  %v2525_v34 = vld [vmem:[#allocation5 + $0x20] sm:$0xff]  }
 0x18a   :  { %v374_v53 = vadd.f32 1e-05, %v342_v16  ;;  %v2607_v41 = vpop.eup %2606  ;;  %v435_v46 = vmul.f32 %v2605_v39, %v3287_v13  ;;  %v495_v23 = vadd.f32 %v3345_v49, %v456_v21  ;;  %v2526_v16 = vld [vmem:[#allocation5 + $0xb8] sm:$0xff]   ;;  %v2528_v10 = vld [vmem:[#allocation5 + $0xc0] sm:$0xff]   ;;  %v2529_v38 = vld [vmem:[#allocation5 + $0x30] sm:$0xff]  }
 0x18b   :  { %v278_v11 = vpop.xlane.xlu1 %277  ;;  %2616 = vrsqrt.f32 %v357_v51  ;;  %v512_v47 = vadd.f32 %v3345_v49, %v473_v31  ;;  %v418_v36 = vmul.f32 %v2607_v41, %v3280_v20  ;;  %2406 = vmatpush3.bf16.xpose.msra.mxu0 %v521_v44  ;;  %2505 = vmatpush3.bf16.xpose.msra.mxu1 %v521_v44  ;;  %v2532_v39 = vld [vmem:[#allocation5 + $0xd0] sm:$0xff]   ;;  %v2531_v51 = vld [vmem:[#allocation5 + $0x38] sm:$0xff]   ;;  %v2533_v31 = vld [vmem:[#allocation5 + $0x40] sm:$0xff]  }
 0x18c   :  { %v326_v18 = vmul.f32 0.0078125, %v278_v11  ;;  %2618 = vrsqrt.f32 %v374_v53  ;;  %v474_v54 = vmul.f32 %v3338_v29, %v435_v46  ;;  %v2534_v53 = vld [vmem:[#allocation5 + $0xd8] sm:$0xff]   ;;  %v2536_v41 = vld [vmem:[#allocation5 + $0xe0] sm:$0xff]   ;;  %v2535_v44 = vld [vmem:[#allocation5 + $0x48] sm:$0xff]  }
 0x18d   :  { %v2609_v61 = vpop.eup %2608  ;;  %v530_v48 = vpack.c.bf16 %v512_v47, %v511_v42  ;;  %v457_v50 = vmul.f32 %v3338_v29, %v418_v36  ;;  %v2538_v11 = vld [vmem:[#allocation5 + $0xe8] sm:$0xff]   ;;  %v2537_v42 = vld [vmem:[#allocation5 + $0x50] sm:$0xff]   ;;  %v2539_v46 = vld [vmem:[#allocation5 + $0x58] sm:$0xff]  }
 0x18e   :  { %v358_v4 = vadd.f32 1e-05, %v326_v18  ;;  %v2611_v12 = vpop.eup %2610  ;;  %v419_v35 = vmul.f32 %v2609_v61, %v3297_v15  ;;  %v513_v25 = vadd.f32 %v3345_v49, %v474_v54  ;;  %v2540_v21 = vld [vmem:[#allocation5 + $0xf0] sm:$0xff]   ;;  %v2542_v18 = vld [vmem:[#allocation5 + $0xf8] sm:$0xff]   ;;  %v2541_v47 = vld [vmem:[#allocation5 + $0x60] sm:$0xff]  }
 0x18f   :  { %2407 = vmatprep.subr.bf16.mxu0 %v530_v48  ;;  %2498 = vmatprep.subr.bf16.mxu1 %v530_v48  ;;  %v496_v13 = vadd.f32 %v3345_v49, %v457_v50  ;;  %v436_v20 = vmul.f32 %v2611_v12, %v3290_v22  ;;  %v2546_v36 = vld [vmem:[#allocation5 + $0x100] sm:$0xff]   ;;  %v2543_v61 = vld [vmem:[#allocation5 + $0x68] sm:$0xff]   ;;  %v2544_v48 = vld [vmem:[#allocation5 + $0x70] sm:$0xff]  }
 0x190   :  { %2620 = vrsqrt.f32 %v358_v4  ;;  %v458_v58 = vmul.f32 %v3338_v29, %v419_v35  ;;  %v2548_v4 = vld [vmem:[#allocation5 + $0x108] sm:$0xff]   ;;  %v2550_v50 = vld [vmem:[#allocation5 + $0x110] sm:$0xff]   ;;  %v2545_v12 = vld [vmem:[#allocation5 + $0x78] sm:$0xff]  }
 0x191   :  { %v2613_v55 = vpop.eup %2612  ;;  %v522_v56 = vpack.c.bf16 %v496_v13, %v495_v23  ;;  %v475_v57 = vmul.f32 %v3338_v29, %v436_v20  ;;  %v2552_v23 = vld [vmem:[#allocation5 + $0x118] sm:$0xff]   ;;  %v2547_v35 = vld [vmem:[#allocation5 + $0x80] sm:$0xff]   ;;  %v2549_v20 = vld [vmem:[#allocation5 + $0x88] sm:$0xff]  }
 0x192   :  { %v2615_v52 = vpop.eup %2614  ;;  %v437_v45 = vmul.f32 %v2613_v55, %v3307_v17  ;;  %v497_v63 = vadd.f32 %v3345_v49, %v458_v58  ;;  %v2554_v13 = vld [vmem:[#allocation5 + $0x120] sm:$0xff]   ;;  %v2555_v54 = vld [vmem:[#allocation5 + $0x128] sm:$0xff]   ;;  %v2551_v55 = vld [vmem:[#allocation5 + $0x90] sm:$0xff]  }
 0x193   :  { %v514_v15 = vadd.f32 %v3345_v49, %v475_v57  ;;  %v420_v62 = vmul.f32 %v2615_v52, %v3300_v24  ;;  %2408 = vmatpush3.bf16.xpose.msra.mxu0 %v522_v56  ;;  %2506 = vmatpush3.bf16.xpose.msra.mxu1 %v522_v56  ;;  %v2556_v56 = vld [vmem:[#allocation5 + $0x130] sm:$0xff]   ;;  %v2553_v57 = vld [vmem:[#allocation5 + $0x98] sm:$0xff]  }
 0x194   :  { %v476_v24 = vmul.f32 %v3338_v29, %v437_v45  ;;  %v2557_v52 = vld [vmem:[#allocation5 + $0x138] sm:$0xff]  }
 0x195   :  { %v2617_v22 = vpop.eup %2616  ;;  %v531_v59 = vpack.c.bf16 %v514_v15, %v513_v25  ;;  %v459_v14 = vmul.f32 %v3338_v29, %v420_v62 }
 0x196   :  { %v2619_v43 = vpop.eup %2618  ;;  %v421_v8 = vmul.f32 %v2617_v22, %v3317_v19  ;;  %v515_v6 = vadd.f32 %v3345_v49, %v476_v24 }
 0x197   :  { %2409 = vmatprep.subr.bf16.mxu0 %v531_v59  ;;  %2499 = vmatprep.subr.bf16.mxu1 %v531_v59  ;;  %v498_v5 = vadd.f32 %v3345_v49, %v459_v14  ;;  %v438_v0 = vmul.f32 %v2619_v43, %v3310_v26 }
 0x198   :  { %v460_v27 = vmul.f32 %v3338_v29, %v421_v8 }
 0x199   :  { %v523_v1 = vpack.c.bf16 %v498_v5, %v497_v63  ;;  %v477_v37 = vmul.f32 %v3338_v29, %v438_v0 }
 0x19a   :  { %v2621_v17 = vpop.eup %2620  ;;  %v499_v26 = vadd.f32 %v3345_v49, %v460_v27 }
 0x19b   :  { %v422_v2 = vmul.f32 %v2621_v17, %v3320_v28  ;;  %v516_v19 = vadd.f32 %v3345_v49, %v477_v37  ;;  %2410 = vmatpush3.bf16.xpose.msra.mxu0 %v523_v1  ;;  %2507 = vmatpush3.bf16.xpose.msra.mxu1 %v523_v1  ;;  %v2519_v28 = vld [vmem:[#allocation5 + $0x8] sm:$0xff]  }
 0x19d   :  { %v461_v3 = vmul.f32 %v3338_v29, %v422_v2  ;;  %v532_v7 = vpack.c.bf16 %v516_v19, %v515_v6  ;;  %v2524_v29 = vld [vmem:[#allocation5 + $0xb0] sm:$0xff]  }
 0x19f   :  { %v500_v9 = vadd.f32 %v3345_v49, %v461_v3  ;;  %2411 = vmatprep.subr.bf16.mxu0 %v532_v7  ;;  %2500 = vmatprep.subr.bf16.mxu1 %v532_v7  ;;  %v2523_v49 = vld [vmem:[#allocation5 + $0x18] sm:$0xff]  }
 0x1a1   :  { %v524_v32 = vpack.c.bf16 %v500_v9, %v499_v26 }
 0x1a3   :  { %2412 = vmatpush3.bf16.xpose.msra.mxu0 %v524_v32  ;;  %2508 = vmatpush3.bf16.xpose.msra.mxu1 %v524_v32 }
 0x1aa   :  { %2414 = vmatmul.mubr.bf16.vlgmr.msra.gmra.mrb[0].mxu0 %v3328_v40  ;;  %2454 = vmatmul.mubr.bf16.vlgmr.msra.gmra.mrb[0].mxu1 %v3331_v30  ;;  %v2527_v40 = vld [vmem:[#allocation5 + $0x28] sm:$0xff]  }
 0x1ab   :  { %2415 = vmatprep.mubr.bf16.mxu0 %v2519_v28  ;;  %2455 = vmatprep.mubr.bf16.mxu1 %v2522_v33  ;;  %v2530_v30 = vld [vmem:[#allocation5 + $0xc8] sm:$0xff]  }
 0x1b2   :  { %2416 = vmatmul.mubr.bf16.gmra.mrb[4].mxu0 %v2519_v28  ;;  %2456 = vmatmul.mubr.bf16.gmra.mrb[4].mxu1 %v2522_v33 }
 0x1b3   :  { %2417 = vmatprep.mubr.bf16.mxu0 %v2521_v60  ;;  %2457 = vmatprep.mubr.bf16.mxu1 %v2524_v29 }
 0x1ba   :  { %2418 = vmatmul.mubr.bf16.gmra.mrb[8].mxu0 %v2521_v60  ;;  %2458 = vmatmul.mubr.bf16.gmra.mrb[8].mxu1 %v2524_v29 }
 0x1bb   :  { %2419 = vmatprep.mubr.bf16.mxu0 %v2523_v49  ;;  %2459 = vmatprep.mubr.bf16.mxu1 %v2526_v16 }
 0x1c2   :  { %2420 = vmatmul.mubr.bf16.gmra.mrb[12].mxu0 %v2523_v49  ;;  %2460 = vmatmul.mubr.bf16.gmra.mrb[12].mxu1 %v2526_v16 }
 0x1c3   :  { %2421 = vmatprep.mubr.bf16.mxu0 %v2525_v34  ;;  %2461 = vmatprep.mubr.bf16.mxu1 %v2528_v10 }
 0x1ca   :  { %2422 = vmatmul.mubr.bf16.gmra.mrb[16].mxu0 %v2525_v34  ;;  %2462 = vmatmul.mubr.bf16.gmra.mrb[16].mxu1 %v2528_v10 }
 0x1cb   :  { %2423 = vmatprep.mubr.bf16.mxu0 %v2527_v40  ;;  %2463 = vmatprep.mubr.bf16.mxu1 %v2530_v30 }
 0x1d2   :  { %2424 = vmatmul.mubr.bf16.gmra.mrb[20].mxu0 %v2527_v40  ;;  %2464 = vmatmul.mubr.bf16.gmra.mrb[20].mxu1 %v2530_v30 }
 0x1d3   :  { %2425 = vmatprep.mubr.bf16.mxu0 %v2529_v38  ;;  %2465 = vmatprep.mubr.bf16.mxu1 %v2532_v39 }
 0x1da   :  { %2426 = vmatmul.mubr.bf16.gmra.mrb[24].mxu0 %v2529_v38  ;;  %2466 = vmatmul.mubr.bf16.gmra.mrb[24].mxu1 %v2532_v39 }
 0x1db   :  { %2427 = vmatprep.mubr.bf16.mxu0 %v2531_v51  ;;  %2467 = vmatprep.mubr.bf16.mxu1 %v2534_v53 }
 0x1e2   :  { %2428 = vmatmul.mubr.bf16.gmra.mrb[28].mxu0 %v2531_v51  ;;  %2468 = vmatmul.mubr.bf16.gmra.mrb[28].mxu1 %v2534_v53  ;;  %v1288_v51 = vlaneseq }
 0x1e3   :  { %2429 = vmatprep.mubr.bf16.mxu0 %v2533_v31  ;;  %2469 = vmatprep.mubr.bf16.mxu1 %v2536_v41 }
 0x1ea   :  { %2430 = vmatmul.mubr.bf16.gmra.mrb[32].mxu0 %v2533_v31  ;;  %2470 = vmatmul.mubr.bf16.gmra.mrb[32].mxu1 %v2536_v41 }
 0x1eb   :  { %2431 = vmatprep.mubr.bf16.mxu0 %v2535_v44  ;;  %2471 = vmatprep.mubr.bf16.mxu1 %v2538_v11 }
 0x1f2   :  { %2432 = vmatmul.mubr.bf16.gmra.mrb[36].mxu0 %v2535_v44  ;;  %2472 = vmatmul.mubr.bf16.gmra.mrb[36].mxu1 %v2538_v11 }
 0x1f3   :  { %2433 = vmatprep.mubr.bf16.mxu0 %v2537_v42  ;;  %2473 = vmatprep.mubr.bf16.mxu1 %v2540_v21 }
 0x1fa   :  { %2434 = vmatmul.mubr.bf16.gmra.mrb[40].mxu0 %v2537_v42  ;;  %2474 = vmatmul.mubr.bf16.gmra.mrb[40].mxu1 %v2540_v21 }
 0x1fb   :  { %2435 = vmatprep.mubr.bf16.mxu0 %v2539_v46  ;;  %2475 = vmatprep.mubr.bf16.mxu1 %v2542_v18 }
 0x202   :  { %2436 = vmatmul.mubr.bf16.gmra.mrb[44].mxu0 %v2539_v46  ;;  %2476 = vmatmul.mubr.bf16.gmra.mrb[44].mxu1 %v2542_v18 }
 0x203   :  { %2437 = vmatprep.mubr.bf16.mxu0 %v2541_v47  ;;  %2477 = vmatprep.mubr.bf16.mxu1 %v2546_v36 }
 0x20a   :  { %2438 = vmatmul.mubr.bf16.gmra.mrb[48].mxu0 %v2541_v47  ;;  %2478 = vmatmul.mubr.bf16.gmra.mrb[48].mxu1 %v2546_v36  ;;  %v1289_v47 = vshrl.u32 %v1288_v51, 7 }
 0x20b   :  { %2439 = vmatprep.mubr.bf16.mxu0 %v2543_v61  ;;  %2479 = vmatprep.mubr.bf16.mxu1 %v2548_v4 }
 0x212   :  { %2440 = vmatmul.mubr.bf16.gmra.mrb[52].mxu0 %v2543_v61  ;;  %2480 = vmatmul.mubr.bf16.gmra.mrb[52].mxu1 %v2548_v4 }
 0x213   :  { %2441 = vmatprep.mubr.bf16.mxu0 %v2544_v48  ;;  %2481 = vmatprep.mubr.bf16.mxu1 %v2550_v50 }
 0x21a   :  { %2442 = vmatmul.mubr.bf16.gmra.mrb[56].mxu0 %v2544_v48  ;;  %2482 = vmatmul.mubr.bf16.gmra.mrb[56].mxu1 %v2550_v50 }
 0x21b   :  { %2443 = vmatprep.mubr.bf16.mxu0 %v2545_v12  ;;  %2483 = vmatprep.mubr.bf16.mxu1 %v2552_v23 }
 0x222   :  { %2444 = vmatmul.mubr.bf16.gmra.mrb[60].mxu0 %v2545_v12  ;;  %2484 = vmatmul.mubr.bf16.gmra.mrb[60].mxu1 %v2552_v23 }
 0x223   :  { %2445 = vmatprep.mubr.bf16.mxu0 %v2547_v35  ;;  %2485 = vmatprep.mubr.bf16.mxu1 %v2554_v13 }
 0x22a   :  { %2446 = vmatmul.mubr.bf16.gmra.mrb[64].mxu0 %v2547_v35  ;;  %2486 = vmatmul.mubr.bf16.gmra.mrb[64].mxu1 %v2554_v13 }
 0x22b   :  { %2447 = vmatprep.mubr.bf16.mxu0 %v2549_v20  ;;  %2487 = vmatprep.mubr.bf16.mxu1 %v2555_v54 }
 0x232   :  { %2448 = vmatmul.mubr.bf16.gmra.mrb[68].mxu0 %v2549_v20  ;;  %2488 = vmatmul.mubr.bf16.gmra.mrb[68].mxu1 %v2555_v54 }
 0x233   :  { %2449 = vmatprep.mubr.bf16.mxu0 %v2551_v55  ;;  %2489 = vmatprep.mubr.bf16.mxu1 %v2556_v56 }
 0x23a   :  { %2450 = vmatmul.mubr.bf16.gmra.mrb[72].mxu0 %v2551_v55  ;;  %2490 = vmatmul.mubr.bf16.gmra.mrb[72].mxu1 %v2556_v56  ;;  %v1290_v55 = vsub.s32 0, %v1289_v47 }
 0x23b   :  { %2451 = vmatprep.mubr.bf16.mxu0 %v2553_v57  ;;  %2491 = vmatprep.mubr.bf16.mxu1 %v2557_v52 }
 0x242   :  { %2452 = vmatmul.mubr.bf16.gmra.mrb[76].mxu0 %v2553_v57  ;;  %2492 = vmatmul.mubr.bf16.gmra.mrb[76].mxu1 %v2557_v52 }
 0x27d   :  { %v3442_v58 = vpop.f32.mrb[0].mxu0  ;;  %v1087_v25 = vpop.f32.mrb[0].mxu1 }
 0x27e   :  { %v3444_v15 = vpop.f32.mrb[1].mxu0  ;;  %v2253_v62 = vmul.f32 -1.442695, %v1087_v25  ;;  %v1089_v45 = vpop.f32.mrb[1].mxu1 }
 0x27f   :  { %v3446_v22 = vpop.f32.mrb[2].mxu0  ;;  %v2254_v59 = vmul.f32 -1.442695, %v1089_v45  ;;  %v1091_v14 = vpop.f32.mrb[2].mxu1  ;;  %v1286_v45 = vld [vmem:[%s3607_s1] sm:$0x3] }
 0x280   :  { %v3448_v43 = vpop.f32.mrb[3].mxu0  ;;  %2622 = vpow2.f32 %v2253_v62  ;;  %v2255_v63 = vmul.f32 -1.442695, %v1091_v14  ;;  %v1093_v8 = vpop.f32.mrb[3].mxu1  ;;  %s3002_s1 = smov [#allocation8]  }
 0x281   :  { %2624 = vpow2.f32 %v2254_v59  ;;  %v2256_v5 = vmul.f32 -1.442695, %v1093_v8  ;;  %v1294_v59 = vsub.s32 1, %v1289_v47  ;;  %s2163_s8 = sshll.u32 %s3002_s1, 4  ;;  %s2164_s8 = int_to_ptr.vmem [resolvable:$true] %s2163_s8 }
 0x282   :  { %2626 = vpow2.f32 %v2255_v63  ;;  %s2922_s9 = scalar_lea.vmem %s2164_s8, 2048  ;;  %p2927_p3 = scmp.lt.s32.totalorder %s2164_s8, %s2164_s8 }
 0x283   :  { %2628 = vpow2.f32 %v2256_v5  ;;  %p2923_p2 = scmp.ne.s32.totalorder %s2164_s8, %s2922_s9  ;;  %p2928_p4 = scmp.lt.s32.totalorder %s2922_s9, %s2922_s9 }
 0x285   :  { %v3450_v0 = vpop.f32.mrb[4].mxu0  ;;  %v1097_v24 = vpop.f32.mrb[4].mxu1  ;;  %p2929_p5 = por %p2928_p4, %p2927_p3 }
 0x286   :  { %v3452_v17 = vpop.f32.mrb[5].mxu0  ;;  %v2257_v1 = vmul.f32 -1.442695, %v1097_v24  ;;  %v1099_v37 = vpop.f32.mrb[5].mxu1 }
 0x287   :  { %v3454_v2 = vpop.f32.mrb[6].mxu0  ;;  %v2258_v27 = vmul.f32 -1.442695, %v1099_v37  ;;  %v1101_v6 = vpop.f32.mrb[6].mxu1  ;;  %p2930_p6 = pnand %p2929_p5, %p2923_p2 }
 0x288   :  { %v3456_v19 = vpop.f32.mrb[7].mxu0  ;;  %2630 = vpow2.f32 %v2257_v1  ;;  %v2259_v3 = vmul.f32 -1.442695, %v1101_v6  ;;  %v1103_v7 = vpop.f32.mrb[7].mxu1  ;;  %v3477_v1 = vrot.slane %v1286_v45, %v1290_v55  ;;  %v3479_v6 = vrot.slane %v1286_v45, %v1294_v59 }
 0x289   :  { %2632 = vpow2.f32 %v2258_v27  ;;  %v2260_v26 = vmul.f32 -1.442695, %v1103_v7 }
 0x28a   :  { %v2623_v9 = vpop.eup %2622  ;;  %2634 = vpow2.f32 %v2259_v3 }
 0x28b   :  { %v2625_v32 = vpop.eup %2624  ;;  %v1442_v28 = vadd.f32 1.0, %v2623_v9  ;;  %2636 = vpow2.f32 %v2260_v26 }
 0x28c   :  { %v1443_v33 = vadd.f32 1.0, %v2625_v32  ;;  %v2627_v60 = vpop.eup %2626 }
 0x28d   :  { %v3458_v29 = vpop.f32.mrb[8].mxu0  ;;  %v1107_v49 = vpop.f32.mrb[8].mxu1  ;;  %2638 = vrcp.f32 %v1442_v28  ;;  %v1444_v53 = vadd.f32 1.0, %v2627_v60 }
 0x28e   :  { %v3460_v16 = vpop.f32.mrb[9].mxu0  ;;  %v2261_v34 = vmul.f32 -1.442695, %v1107_v49  ;;  %v1109_v10 = vpop.f32.mrb[9].mxu1  ;;  %2640 = vrcp.f32 %v1443_v33 }
 0x28f   :  { %v2629_v40 = vpop.eup %2628  ;;  %v3462_v30 = vpop.f32.mrb[10].mxu0  ;;  %v2262_v38 = vmul.f32 -1.442695, %v1109_v10 }
 0x290   :  { %v1111_v39 = vpop.f32.mrb[10].mxu1  ;;  %v3464_v31 = vpop.f32.mrb[11].mxu0  ;;  %2642 = vpow2.f32 %v2261_v34  ;;  %v1445_v21 = vadd.f32 1.0, %v2629_v40 }
 0x291   :  { %v2263_v41 = vmul.f32 -1.442695, %v1111_v39  ;;  %v1113_v44 = vpop.f32.mrb[11].mxu1  ;;  %2644 = vpow2.f32 %v2262_v38 }
 0x292   :  { %v2264_v11 = vmul.f32 -1.442695, %v1113_v44  ;;  %v2631_v42 = vpop.eup %2630 }
 0x293   :  { %v2633_v46 = vpop.eup %2632  ;;  %v1446_v18 = vadd.f32 1.0, %v2631_v42  ;;  %2646 = vpow2.f32 %v2263_v41 }
 0x294   :  { %2648 = vrcp.f32 %v1444_v53  ;;  %v1447_v36 = vadd.f32 1.0, %v2633_v46  ;;  %v2635_v61 = vpop.eup %2634 }
 0x295   :  { %v3466_v4 = vpop.f32.mrb[12].mxu0  ;;  %2650 = vpow2.f32 %v2264_v11  ;;  %v1117_v48 = vpop.f32.mrb[12].mxu1  ;;  %v1448_v56 = vadd.f32 1.0, %v2635_v61 }
 0x296   :  { %2652 = vrcp.f32 %v1445_v21  ;;  %v3468_v50 = vpop.f32.mrb[13].mxu0  ;;  %v2265_v12 = vmul.f32 -1.442695, %v1117_v48  ;;  %v1119_v23 = vpop.f32.mrb[13].mxu1 }
 0x297   :  { %v2637_v35 = vpop.eup %2636  ;;  %2654 = vrcp.f32 %v1446_v18  ;;  %v3470_v13 = vpop.f32.mrb[14].mxu0  ;;  %v2266_v20 = vmul.f32 -1.442695, %v1119_v23 }
 0x298   :  { %v1121_v54 = vpop.f32.mrb[14].mxu1  ;;  %2656 = vrcp.f32 %v1447_v36  ;;  %v3472_v57 = vpop.f32.mrb[15].mxu0  ;;  %v1449_v8 = vadd.f32 1.0, %v2637_v35 }
 0x299   :  { %v2267_v52 = vmul.f32 -1.442695, %v1121_v54  ;;  %v1123_v25 = vpop.f32.mrb[15].mxu1  ;;  %v2639_v62 = vpop.eup %2638  ;;  %2658 = vpow2.f32 %v2265_v12 }
 0x29a   :  { %v2268_v14 = vmul.f32 -1.442695, %v1123_v25  ;;  %v2641_v63 = vpop.eup %2640  ;;  %2660 = vpow2.f32 %v2266_v20 }
 0x29b   :  { %v2643_v5 = vpop.eup %2642  ;;  %2662 = vpow2.f32 %v2267_v52 }
 0x29c   :  { %v2645_v24 = vpop.eup %2644  ;;  %2664 = vrcp.f32 %v1448_v56  ;;  %v1450_v37 = vadd.f32 1.0, %v2643_v5 }
 0x29d   :  { %v2647_v27 = vpop.eup %2646  ;;  %v1451_v3 = vadd.f32 1.0, %v2645_v24  ;;  %v927_v7 = vpop.f32.mrb[16].mxu0  ;;  %2666 = vpow2.f32 %v2268_v14 }
 0x29e   :  { %v1127_v26 = vpop.f32.mrb[16].mxu1  ;;  %v2649_v9 = vpop.eup %2648  ;;  %2668 = vrcp.f32 %v1449_v8  ;;  %v1452_v32 = vadd.f32 1.0, %v2647_v27  ;;  %v1314_v28 = vmul.f32 %v3477_v1, %v927_v7 }
 0x29f   :  { %v929_v33 = vpop.f32.mrb[17].mxu0  ;;  %v2285_v60 = vmul.f32 -1.442695, %v1127_v26  ;;  %v1129_v49 = vpop.f32.mrb[17].mxu1  ;;  %2670 = vrcp.f32 %v1450_v37 }
 0x2a0   :  { %v2651_v34 = vpop.eup %2650  ;;  %v1315_v10 = vmul.f32 %v3479_v6, %v929_v33  ;;  %v931_v40 = vpop.f32.mrb[18].mxu0  ;;  %v2286_v38 = vmul.f32 -1.442695, %v1129_v49  ;;  %2672 = vrcp.f32 %v1451_v3  ;;  %v1538_v53 = vmul.f32 %v2639_v62, %v1314_v28 }
 0x2a1   :  { %v1131_v39 = vpop.f32.mrb[18].mxu1  ;;  %v2653_v51 = vpop.eup %2652  ;;  %v1316_v41 = vmul.f32 %v3477_v1, %v931_v40  ;;  %2674 = vrcp.f32 %v1452_v32  ;;  %v1453_v61 = vadd.f32 1.0, %v2651_v34 }
 0x2a2   :  { %v933_v44 = vpop.f32.mrb[19].mxu0  ;;  %v2287_v11 = vmul.f32 -1.442695, %v1131_v39  ;;  %v1133_v42 = vpop.f32.mrb[19].mxu1  ;;  %v1539_v46 = vmul.f32 %v2641_v63, %v1315_v10  ;;  %2676 = vpow2.f32 %v2285_v60 }
 0x2a3   :  { %v2655_v21 = vpop.eup %2654  ;;  %v1317_v18 = vmul.f32 %v3479_v6, %v933_v44  ;;  %v2288_v47 = vmul.f32 -1.442695, %v1133_v42  ;;  %v1540_v48 = vmul.f32 %v2649_v9, %v1316_v41  ;;  %2678 = vpow2.f32 %v2286_v38 }
 0x2a4   :  { %v2657_v36 = vpop.eup %2656  ;;  %v2357_v23 = vpack.c.bf16 %v1539_v46, %v1538_v53  ;;  %2680 = vpow2.f32 %v2287_v11 }
 0x2a5   :  { %v2659_v12 = vpop.eup %2658  ;;  %v1541_v35 = vmul.f32 %v2653_v51, %v1317_v18  ;;  %v937_v25 = vpop.f32.mrb[20].mxu0  ;;  %2682 = vpow2.f32 %v2288_v47 }
 0x2a6   :  { %v2661_v20 = vpop.eup %2660  ;;  %v1454_v54 = vadd.f32 1.0, %v2659_v12  ;;  %1658 = vst [vmem:[#allocation7 + $0x40] sm:$0xff] %v2357_v23  ;;  %v1137_v62 = vpop.f32.mrb[20].mxu1  ;;  %2684 = vrcp.f32 %v1453_v61  ;;  %v1318_v14 = vmul.f32 %v3477_v1, %v937_v25 }
 0x2a7   :  { %v2663_v55 = vpop.eup %2662  ;;  %v1455_v56 = vadd.f32 1.0, %v2661_v20  ;;  %v2358_v52 = vpack.c.bf16 %v1541_v35, %v1540_v48  ;;  %v939_v63 = vpop.f32.mrb[21].mxu0  ;;  %v2289_v8 = vmul.f32 -1.442695, %v1137_v62 }
 0x2a8   :  { %v2665_v45 = vpop.eup %2664  ;;  %v1456_v59 = vadd.f32 1.0, %v2663_v55  ;;  %v1139_v5 = vpop.f32.mrb[21].mxu1  ;;  %2686 = vrcp.f32 %v1454_v54  ;;  %v1319_v37 = vmul.f32 %v3479_v6, %v939_v63  ;;  %v1542_v9 = vmul.f32 %v2655_v21, %v1318_v14 }
 0x2a9   :  { %v2667_v24 = vpop.eup %2666  ;;  %1659 = vst [vmem:[#allocation7 + $0x48] sm:$0xff] %v2358_v52  ;;  %v941_v27 = vpop.f32.mrb[22].mxu0  ;;  %v2290_v3 = vmul.f32 -1.442695, %v1139_v5  ;;  %2688 = vrcp.f32 %v1455_v56 }
 0x2aa   :  { %v1141_v7 = vpop.f32.mrb[22].mxu1  ;;  %v2669_v26 = vpop.eup %2668  ;;  %v1320_v32 = vmul.f32 %v3477_v1, %v941_v27  ;;  %2690 = vrcp.f32 %v1456_v59  ;;  %v1543_v34 = vmul.f32 %v2657_v36, %v1319_v37  ;;  %v1457_v39 = vadd.f32 1.0, %v2667_v24 }
 0x2ab   :  { %v943_v28 = vpop.f32.mrb[23].mxu0  ;;  %v2291_v33 = vmul.f32 -1.442695, %v1141_v7  ;;  %v1143_v60 = vpop.f32.mrb[23].mxu1  ;;  %2692 = vpow2.f32 %v2289_v8 }
 0x2ac   :  { %v2671_v49 = vpop.eup %2670  ;;  %v1321_v10 = vmul.f32 %v3479_v6, %v943_v28  ;;  %v2292_v40 = vmul.f32 -1.442695, %v1143_v60  ;;  %v1544_v51 = vmul.f32 %v2665_v45, %v1320_v32  ;;  %v2359_v41 = vpack.c.bf16 %v1543_v34, %v1542_v9 }
 0x2ad   :  { %v2673_v38 = vpop.eup %2672  ;;  %2694 = vpow2.f32 %v2290_v3  ;;  %v947_v18 = vpop.f32.mrb[24].mxu0 }
 0x2ae   :  { %v2675_v53 = vpop.eup %2674  ;;  %v1545_v44 = vmul.f32 %v2669_v26, %v1321_v10  ;;  %2696 = vpow2.f32 %v2291_v33  ;;  %1660 = vst [vmem:[#allocation7 + $0x50] sm:$0xff] %v2359_v41  ;;  %v1147_v47 = vpop.f32.mrb[24].mxu1  ;;  %v1322_v48 = vmul.f32 %v3477_v1, %v947_v18 }
 0x2af   :  { %v2677_v11 = vpop.eup %2676  ;;  %2698 = vpow2.f32 %v2292_v40  ;;  %v949_v12 = vpop.f32.mrb[25].mxu0  ;;  %v2293_v23 = vmul.f32 -1.442695, %v1147_v47 }
 0x2b0   :  { %v2679_v42 = vpop.eup %2678  ;;  %v1794_v21 = vadd.f32 1.0, %v2677_v11  ;;  %v2360_v46 = vpack.c.bf16 %v1545_v44, %v1544_v51  ;;  %2700 = vrcp.f32 %v1457_v39  ;;  %v1149_v35 = vpop.f32.mrb[25].mxu1  ;;  %v1323_v55 = vmul.f32 %v3479_v6, %v949_v12 }
 0x2b1   :  { %v2681_v36 = vpop.eup %2680  ;;  %v1795_v61 = vadd.f32 1.0, %v2679_v42  ;;  %v951_v56 = vpop.f32.mrb[26].mxu0  ;;  %v2294_v52 = vmul.f32 -1.442695, %v1149_v35  ;;  %v1546_v59 = vmul.f32 %v2671_v49, %v1322_v48 }
 0x2b2   :  { %v2683_v20 = vpop.eup %2682  ;;  %2702 = vrcp.f32 %v1794_v21  ;;  %v1796_v54 = vadd.f32 1.0, %v2681_v36  ;;  %1661 = vst [vmem:[#allocation7 + $0x58] sm:$0xff] %v2360_v46  ;;  %v1151_v25 = vpop.f32.mrb[26].mxu1  ;;  %v1324_v14 = vmul.f32 %v3477_v1, %v951_v56  ;;  %v1547_v24 = vmul.f32 %v2673_v38, %v1323_v55 }
 0x2b3   :  { %v2685_v62 = vpop.eup %2684  ;;  %2704 = vrcp.f32 %v1795_v61  ;;  %v1797_v45 = vadd.f32 1.0, %v2683_v20  ;;  %v953_v63 = vpop.f32.mrb[27].mxu0  ;;  %v2295_v27 = vmul.f32 -1.442695, %v1151_v25 }
 0x2b4   :  { %v1153_v8 = vpop.f32.mrb[27].mxu1  ;;  %v2687_v5 = vpop.eup %2686  ;;  %2706 = vrcp.f32 %v1796_v54  ;;  %v1325_v37 = vmul.f32 %v3479_v6, %v953_v63  ;;  %v1548_v7 = vmul.f32 %v2675_v53, %v1324_v14  ;;  %v2361_v32 = vpack.c.bf16 %v1547_v24, %v1546_v59 }
 0x2b5   :  { %v2689_v3 = vpop.eup %2688  ;;  %2708 = vrcp.f32 %v1797_v45  ;;  %v2296_v26 = vmul.f32 -1.442695, %v1153_v8  ;;  %v957_v10 = vpop.f32.mrb[28].mxu0 }
 0x2b6   :  { %v2691_v9 = vpop.eup %2690  ;;  %v1549_v28 = vmul.f32 %v2685_v62, %v1325_v37  ;;  %2710 = vpow2.f32 %v2293_v23  ;;  %1662 = vst [vmem:[#allocation7 + $0x60] sm:$0xff] %v2361_v32  ;;  %v1157_v40 = vpop.f32.mrb[28].mxu1  ;;  %v1326_v51 = vmul.f32 %v3477_v1, %v957_v10 }
 0x2b7   :  { %v2693_v33 = vpop.eup %2692  ;;  %2712 = vpow2.f32 %v2294_v52  ;;  %v959_v41 = vpop.f32.mrb[29].mxu0  ;;  %v2297_v53 = vmul.f32 -1.442695, %v1157_v40 }
 0x2b8   :  { %v2695_v60 = vpop.eup %2694  ;;  %v1798_v49 = vadd.f32 1.0, %v2693_v33  ;;  %v2362_v34 = vpack.c.bf16 %v1549_v28, %v1548_v7  ;;  %2714 = vpow2.f32 %v2295_v27  ;;  %v1159_v44 = vpop.f32.mrb[29].mxu1  ;;  %v1327_v21 = vmul.f32 %v3479_v6, %v959_v41 }
 0x2b9   :  { %v2697_v38 = vpop.eup %2696  ;;  %v1799_v39 = vadd.f32 1.0, %v2695_v60  ;;  %2716 = vpow2.f32 %v2296_v26  ;;  %v961_v46 = vpop.f32.mrb[30].mxu0  ;;  %v2298_v18 = vmul.f32 -1.442695, %v1159_v44  ;;  %v1550_v48 = vmul.f32 %v2687_v5, %v1326_v51 }
 0x2ba   :  { %v2699_v11 = vpop.eup %2698  ;;  %2718 = vrcp.f32 %v1798_v49  ;;  %v1800_v42 = vadd.f32 1.0, %v2697_v38  ;;  %1663 = vst [vmem:[#allocation7 + $0x68] sm:$0xff] %v2362_v34  ;;  %v1161_v47 = vpop.f32.mrb[30].mxu1  ;;  %v1328_v12 = vmul.f32 %v3477_v1, %v961_v46  ;;  %v1551_v54 = vmul.f32 %v2689_v3, %v1327_v21 }
 0x2bb   :  { %v2701_v36 = vpop.eup %2700  ;;  %2720 = vrcp.f32 %v1799_v39  ;;  %v1801_v61 = vadd.f32 1.0, %v2699_v11  ;;  %v963_v23 = vpop.f32.mrb[31].mxu0  ;;  %v2299_v56 = vmul.f32 -1.442695, %v1161_v47 }
 0x2bc   :  { %v1163_v35 = vpop.f32.mrb[31].mxu1  ;;  %v2703_v20 = vpop.eup %2702  ;;  %2722 = vrcp.f32 %v1800_v42  ;;  %v1329_v55 = vmul.f32 %v3479_v6, %v963_v23  ;;  %v1552_v25 = vmul.f32 %v2691_v9, %v1328_v12  ;;  %v2363_v59 = vpack.c.bf16 %v1551_v54, %v1550_v48 }
 0x2bd   :  { %v2705_v52 = vpop.eup %2704  ;;  %2724 = vrcp.f32 %v1801_v61  ;;  %v2300_v62 = vmul.f32 -1.442695, %v1163_v35  ;;  %v967_v24 = vpop.f32.mrb[32].mxu0 }
 0x2be   :  { %v2707_v45 = vpop.eup %2706  ;;  %v1553_v14 = vmul.f32 %v2701_v36, %v1329_v55  ;;  %2726 = vpow2.f32 %v2297_v53  ;;  %1664 = vst [vmem:[#allocation7 + $0x70] sm:$0xff] %v2363_v59  ;;  %v1167_v37 = vpop.f32.mrb[32].mxu1  ;;  %v1666_v7 = vmul.f32 %v3477_v1, %v967_v24 }
 0x2bf   :  { %v2709_v63 = vpop.eup %2708  ;;  %2728 = vpow2.f32 %v2298_v18  ;;  %v969_v26 = vpop.f32.mrb[33].mxu0  ;;  %v2301_v9 = vmul.f32 -1.442695, %v1167_v37 }
 0x2c0   :  { %v2711_v8 = vpop.eup %2710  ;;  %v2364_v5 = vpack.c.bf16 %v1553_v14, %v1552_v25  ;;  %2730 = vpow2.f32 %v2299_v56  ;;  %v1169_v32 = vpop.f32.mrb[33].mxu1  ;;  %v1667_v60 = vmul.f32 %v3479_v6, %v969_v26  ;;  %v1890_v39 = vmul.f32 %v2703_v20, %v1666_v7 }
 0x2c1   :  { %v2713_v27 = vpop.eup %2712  ;;  %v1802_v3 = vadd.f32 1.0, %v2711_v8  ;;  %2732 = vpow2.f32 %v2300_v62  ;;  %v971_v49 = vpop.f32.mrb[34].mxu0  ;;  %v2302_v34 = vmul.f32 -1.442695, %v1169_v32 }
 0x2c2   :  { %v2715_v28 = vpop.eup %2714  ;;  %v1803_v33 = vadd.f32 1.0, %v2713_v27  ;;  %1665 = vst [vmem:[#allocation7 + $0x78] sm:$0xff] %v2364_v5  ;;  %v1171_v10 = vpop.f32.mrb[34].mxu1  ;;  %v1668_v51 = vmul.f32 %v3477_v1, %v971_v49  ;;  %v1891_v42 = vmul.f32 %v2705_v52, %v1667_v60 }
 0x2c3   :  { %v2717_v40 = vpop.eup %2716  ;;  %2734 = vrcp.f32 %v1802_v3  ;;  %v1804_v38 = vadd.f32 1.0, %v2715_v28  ;;  %v973_v41 = vpop.f32.mrb[35].mxu0  ;;  %v2303_v47 = vmul.f32 -1.442695, %v1171_v10 }
 0x2c4   :  { %v1173_v53 = vpop.f32.mrb[35].mxu1  ;;  %v2719_v44 = vpop.eup %2718  ;;  %2736 = vrcp.f32 %v1803_v33  ;;  %v1805_v11 = vadd.f32 1.0, %v2717_v40  ;;  %v1669_v21 = vmul.f32 %v3479_v6, %v973_v41  ;;  %v1892_v18 = vmul.f32 %v2707_v45, %v1668_v51 }
 0x2c5   :  { %v2721_v46 = vpop.eup %2720  ;;  %2738 = vrcp.f32 %v1804_v38  ;;  %v2365_v61 = vpack.c.bf16 %v1891_v42, %v1890_v39  ;;  %v2304_v12 = vmul.f32 -1.442695, %v1173_v53  ;;  %v977_v54 = vpop.f32.mrb[36].mxu0 }
 0x2c6   :  { %v2723_v36 = vpop.eup %2722  ;;  %2740 = vrcp.f32 %v1805_v11  ;;  %v1893_v48 = vmul.f32 %v2709_v63, %v1669_v21  ;;  %v1177_v55 = vpop.f32.mrb[36].mxu1  ;;  %v1670_v25 = vmul.f32 %v3477_v1, %v977_v54 }
 0x2c7   :  { %v2725_v23 = vpop.eup %2724  ;;  %2742 = vpow2.f32 %v2301_v9  ;;  %2018 = vst [vmem:[#allocation8] sm:$0xff] %v2365_v61  ;;  %v979_v62 = vpop.f32.mrb[37].mxu0  ;;  %v2305_v45 = vmul.f32 -1.442695, %v1177_v55 }
 0x2c8   :  { %v2727_v35 = vpop.eup %2726  ;;  %v2366_v20 = vpack.c.bf16 %v1893_v48, %v1892_v18  ;;  %2744 = vpow2.f32 %v2302_v34  ;;  %v1179_v59 = vpop.f32.mrb[37].mxu1  ;;  %v1671_v63 = vmul.f32 %v3479_v6, %v979_v62  ;;  %v1894_v7 = vmul.f32 %v2719_v44, %v1670_v25 }
 0x2c9   :  { %v2729_v56 = vpop.eup %2728  ;;  %v1806_v52 = vadd.f32 1.0, %v2727_v35  ;;  %2746 = vpow2.f32 %v2303_v47  ;;  %v981_v5 = vpop.f32.mrb[38].mxu0  ;;  %v2306_v24 = vmul.f32 -1.442695, %v1179_v59 }
 0x2ca   :  { %v2731_v14 = vpop.eup %2730  ;;  %v1807_v8 = vadd.f32 1.0, %v2729_v56  ;;  %2019 = vst [vmem:[#allocation8 + $0x8] sm:$0xff] %v2366_v20  ;;  %2748 = vpow2.f32 %v2304_v12  ;;  %v1181_v37 = vpop.f32.mrb[38].mxu1  ;;  %v1672_v26 = vmul.f32 %v3477_v1, %v981_v5  ;;  %v1895_v33 = vmul.f32 %v2721_v46, %v1671_v63 }
 0x2cb   :  { %v2733_v27 = vpop.eup %2732  ;;  %2750 = vrcp.f32 %v1806_v52  ;;  %v1808_v3 = vadd.f32 1.0, %v2731_v14  ;;  %v983_v9 = vpop.f32.mrb[39].mxu0  ;;  %v2307_v10 = vmul.f32 -1.442695, %v1181_v37 }
 0x2cc   :  { %v1183_v32 = vpop.f32.mrb[39].mxu1  ;;  %2752 = vrcp.f32 %v1807_v8  ;;  %v1809_v28 = vadd.f32 1.0, %v2733_v27  ;;  %v1673_v60 = vmul.f32 %v3479_v6, %v983_v9  ;;  %v1896_v34 = vmul.f32 %v2723_v36, %v1672_v26 }
 0x2cd   :  { %v2735_v49 = vpop.eup %2734  ;;  %2754 = vrcp.f32 %v1808_v3  ;;  %v2367_v38 = vpack.c.bf16 %v1895_v33, %v1894_v7  ;;  %v2308_v51 = vmul.f32 -1.442695, %v1183_v32  ;;  %v987_v11 = vpop.f32.mrb[40].mxu0 }
 0x2ce   :  { %v2737_v40 = vpop.eup %2736  ;;  %2756 = vrcp.f32 %v1809_v28  ;;  %v1897_v39 = vmul.f32 %v2725_v23, %v1673_v60  ;;  %v1187_v42 = vpop.f32.mrb[40].mxu1  ;;  %v1674_v46 = vmul.f32 %v3477_v1, %v987_v11 }
 0x2cf   :  { %v2739_v41 = vpop.eup %2738  ;;  %2758 = vpow2.f32 %v2305_v45  ;;  %2020 = vst [vmem:[#allocation8 + $0x10] sm:$0xff] %v2367_v38  ;;  %v989_v18 = vpop.f32.mrb[41].mxu0  ;;  %v2309_v47 = vmul.f32 -1.442695, %v1187_v42 }
 0x2d0   :  { %v2741_v53 = vpop.eup %2740  ;;  %v2368_v44 = vpack.c.bf16 %v1897_v39, %v1896_v34  ;;  %2760 = vpow2.f32 %v2306_v24  ;;  %v1189_v36 = vpop.f32.mrb[41].mxu1  ;;  %v1675_v12 = vmul.f32 %v3479_v6, %v989_v18  ;;  %v1898_v56 = vmul.f32 %v2735_v49, %v1674_v46 }
 0x2d1   :  { %v2743_v21 = vpop.eup %2742  ;;  %2762 = vpow2.f32 %v2307_v10  ;;  %v991_v23 = vpop.f32.mrb[42].mxu0  ;;  %v2310_v35 = vmul.f32 -1.442695, %v1189_v36 }
 0x2d2   :  { %v2745_v61 = vpop.eup %2744  ;;  %v1810_v48 = vadd.f32 1.0, %v2743_v21  ;;  %2021 = vst [vmem:[#allocation8 + $0x18] sm:$0xff] %v2368_v44  ;;  %2764 = vpow2.f32 %v2308_v51  ;;  %v1191_v20 = vpop.f32.mrb[42].mxu1  ;;  %v1676_v52 = vmul.f32 %v3477_v1, %v991_v23  ;;  %v1899_v14 = vmul.f32 %v2737_v40, %v1675_v12 }
 0x2d3   :  { %v2747_v54 = vpop.eup %2746  ;;  %v1811_v55 = vadd.f32 1.0, %v2745_v61  ;;  %v993_v25 = vpop.f32.mrb[43].mxu0  ;;  %2766 = vpow2.f32 %v2309_v47  ;;  %v2311_v37 = vmul.f32 -1.442695, %v1191_v20 }
 0x2d4   :  { %v1193_v62 = vpop.f32.mrb[43].mxu1  ;;  %v2749_v45 = vpop.eup %2748  ;;  %2768 = vrcp.f32 %v1810_v48  ;;  %v1812_v59 = vadd.f32 1.0, %v2747_v54  ;;  %v1677_v8 = vmul.f32 %v3479_v6, %v993_v25  ;;  %v1900_v24 = vmul.f32 %v2739_v41, %v1676_v52 }
 0x2d5   :  { %v2751_v63 = vpop.eup %2750  ;;  %2770 = vrcp.f32 %v1811_v55  ;;  %v1813_v5 = vadd.f32 1.0, %v2749_v45  ;;  %v2369_v3 = vpack.c.bf16 %v1899_v14, %v1898_v56  ;;  %v2312_v26 = vmul.f32 -1.442695, %v1193_v62  ;;  %v997_v33 = vpop.f32.mrb[44].mxu0 }
 0x2d6   :  { %v2753_v27 = vpop.eup %2752  ;;  %2772 = vrcp.f32 %v1812_v59  ;;  %v1901_v7 = vmul.f32 %v2741_v53, %v1677_v8  ;;  %v1197_v60 = vpop.f32.mrb[44].mxu1  ;;  %v1678_v34 = vmul.f32 %v3477_v1, %v997_v33 }
 0x2d7   :  { %v2755_v9 = vpop.eup %2754  ;;  %2774 = vrcp.f32 %v1813_v5  ;;  %2022 = vst [vmem:[#allocation8 + $0x20] sm:$0xff] %v2369_v3  ;;  %v999_v10 = vpop.f32.mrb[45].mxu0  ;;  %v2313_v40 = vmul.f32 -1.442695, %v1197_v60 }
 0x2d8   :  { %v2757_v32 = vpop.eup %2756  ;;  %v2370_v28 = vpack.c.bf16 %v1901_v7, %v1900_v24  ;;  %2776 = vpow2.f32 %v2310_v35  ;;  %v1199_v38 = vpop.f32.mrb[45].mxu1  ;;  %v1679_v41 = vmul.f32 %v3479_v6, %v999_v10  ;;  %v1902_v21 = vmul.f32 %v2751_v63, %v1678_v34 }
 0x2d9   :  { %v2759_v49 = vpop.eup %2758  ;;  %2778 = vpow2.f32 %v2311_v37  ;;  %v1001_v53 = vpop.f32.mrb[46].mxu0  ;;  %v2314_v54 = vmul.f32 -1.442695, %v1199_v38 }
 0x2da   :  { %v2761_v39 = vpop.eup %2760  ;;  %v1814_v51 = vadd.f32 1.0, %v2759_v49  ;;  %2023 = vst [vmem:[#allocation8 + $0x28] sm:$0xff] %v2370_v28  ;;  %2780 = vpow2.f32 %v2312_v26  ;;  %v1201_v44 = vpop.f32.mrb[46].mxu1  ;;  %v1680_v46 = vmul.f32 %v3477_v1, %v1001_v53  ;;  %v1903_v48 = vmul.f32 %v2753_v27, %v1679_v41 }
 0x2db   :  { %v2763_v11 = vpop.eup %2762  ;;  %v1815_v42 = vadd.f32 1.0, %v2761_v39  ;;  %v1003_v18 = vpop.f32.mrb[47].mxu0  ;;  %2782 = vpow2.f32 %v2313_v40  ;;  %v2315_v25 = vmul.f32 -1.442695, %v1201_v44 }
 0x2dc   :  { %v1203_v47 = vpop.f32.mrb[47].mxu1  ;;  %v2765_v36 = vpop.eup %2764  ;;  %v1816_v61 = vadd.f32 1.0, %v2763_v11  ;;  %v1681_v12 = vmul.f32 %v3479_v6, %v1003_v18  ;;  %2784 = vrcp.f32 %v1814_v51  ;;  %v1904_v20 = vmul.f32 %v2755_v9, %v1680_v46 }
 0x2dd   :  { %v2767_v23 = vpop.eup %2766  ;;  %v1817_v35 = vadd.f32 1.0, %v2765_v36  ;;  %2786 = vrcp.f32 %v1815_v42  ;;  %v2371_v56 = vpack.c.bf16 %v1903_v48, %v1902_v21  ;;  %v2316_v45 = vmul.f32 -1.442695, %v1203_v47  ;;  %v1007_v8 = vpop.f32.mrb[48].mxu0 }
 0x2de   :  { %v2769_v55 = vpop.eup %2768  ;;  %v1905_v52 = vmul.f32 %v2757_v32, %v1681_v12  ;;  %2788 = vrcp.f32 %v1816_v61  ;;  %v1207_v63 = vpop.f32.mrb[48].mxu1  ;;  %v1682_v24 = vmul.f32 %v3477_v1, %v1007_v8  ;;  %v1818_v7 = vadd.f32 1.0, %v2767_v23 }
 0x2df   :  { %v2771_v62 = vpop.eup %2770  ;;  %2790 = vrcp.f32 %v1817_v35  ;;  %2024 = vst [vmem:[#allocation8 + $0x30] sm:$0xff] %v2371_v56  ;;  %v1009_v37 = vpop.f32.mrb[49].mxu0 }
 0x2e0   :  { %v2773_v59 = vpop.eup %2772  ;;  %v2372_v14 = vpack.c.bf16 %v1905_v52, %v1904_v20  ;;  %2792 = vpow2.f32 %v2314_v54  ;;  %v1209_v27 = vpop.f32.mrb[49].mxu1  ;;  %v1683_v26 = vmul.f32 %v3479_v6, %v1009_v37  ;;  %v1906_v49 = vmul.f32 %v2769_v55, %v1682_v24 }
 0x2e1   :  { %v2775_v5 = vpop.eup %2774  ;;  %v1011_v9 = vpop.f32.mrb[50].mxu0  ;;  %2794 = vpow2.f32 %v2315_v25  ;;  %v2381_v32 = vpack.c.bf16 %v1209_v27, %v1207_v63 }
 0x2e2   :  { %v2777_v3 = vpop.eup %2776  ;;  %2025 = vst [vmem:[#allocation8 + $0x38] sm:$0xff] %v2372_v14  ;;  %v1211_v28 = vpop.f32.mrb[50].mxu1  ;;  %v1684_v34 = vmul.f32 %v3477_v1, %v1011_v9  ;;  %2796 = vpow2.f32 %v2316_v45  ;;  %v1907_v51 = vmul.f32 %v2771_v62, %v1683_v26 }
 0x2e3   :  { %v2779_v33 = vpop.eup %2778  ;;  %v1819_v60 = vadd.f32 1.0, %v2777_v3  ;;  %v1013_v10 = vpop.f32.mrb[51].mxu0  ;;  %2130 = vst [vmem:[#allocation10] sm:$0xff] %v2381_v32  ;;  %2798 = vrcp.f32 %v1818_v7 }
 0x2e4   :  { %v1213_v40 = vpop.f32.mrb[51].mxu1  ;;  %v2781_v38 = vpop.eup %2780  ;;  %v1820_v39 = vadd.f32 1.0, %v2779_v33  ;;  %v1685_v41 = vmul.f32 %v3479_v6, %v1013_v10  ;;  %v1908_v11 = vmul.f32 %v2773_v59, %v1684_v34  ;;  %v2373_v21 = vpack.c.bf16 %v1907_v51, %v1906_v49 }
 0x2e5   :  { %v2382_v53 = vpack.c.bf16 %v1213_v40, %v1211_v28  ;;  %v1821_v44 = vadd.f32 1.0, %v2781_v38  ;;  %v2783_v42 = vpop.eup %2782  ;;  %2800 = vrcp.f32 %v1819_v60  ;;  %v1017_v61 = vpop.f32.mrb[52].mxu0 }
 0x2e6   :  { %v1909_v46 = vmul.f32 %v2775_v5, %v1685_v41  ;;  %v2785_v18 = vpop.eup %2784  ;;  %2802 = vrcp.f32 %v1820_v39  ;;  %2026 = vst [vmem:[#allocation8 + $0x40] sm:$0xff] %v2373_v21  ;;  %v1217_v48 = vpop.f32.mrb[52].mxu1  ;;  %v1686_v23 = vmul.f32 %v3477_v1, %v1017_v61  ;;  %v1822_v55 = vadd.f32 1.0, %v2783_v42 }
 0x2e7   :  { %2131 = vst [vmem:[#allocation10 + $0x8] sm:$0xff] %v2382_v53  ;;  %v2787_v47 = vpop.eup %2786  ;;  %2804 = vrcp.f32 %v1821_v44  ;;  %v1019_v35 = vpop.f32.mrb[53].mxu0 }
 0x2e8   :  { %v2374_v36 = vpack.c.bf16 %v1909_v46, %v1908_v11  ;;  %v2789_v12 = vpop.eup %2788  ;;  %v1219_v20 = vpop.f32.mrb[53].mxu1  ;;  %v1687_v56 = vmul.f32 %v3479_v6, %v1019_v35  ;;  %v1910_v59 = vmul.f32 %v2785_v18, %v1686_v23  ;;  %2806 = vrcp.f32 %v1822_v55 }
 0x2e9   :  { %v2791_v54 = vpop.eup %2790  ;;  %v1021_v52 = vpop.f32.mrb[54].mxu0  ;;  %v2383_v25 = vpack.c.bf16 %v1219_v20, %v1217_v48 }
 0x2ea   :  { %2027 = vst [vmem:[#allocation8 + $0x48] sm:$0xff] %v2374_v36  ;;  %v1221_v62 = vpop.f32.mrb[54].mxu1  ;;  %v2793_v45 = vpop.eup %2792  ;;  %v1688_v14 = vmul.f32 %v3477_v1, %v1021_v52  ;;  %v1911_v37 = vmul.f32 %v2787_v47, %v1687_v56 }
 0x2eb   :  { %v1023_v8 = vpop.f32.mrb[55].mxu0  ;;  %v1223_v63 = vpop.f32.mrb[55].mxu1  ;;  %v1823_v24 = vadd.f32 1.0, %v2793_v45  ;;  %2132 = vst [vmem:[#allocation10 + $0x10] sm:$0xff] %v2383_v25 }
 0x2ec   :  { %v2795_v5 = vpop.eup %2794  ;;  %v1689_v27 = vmul.f32 %v3479_v6, %v1023_v8  ;;  %v2384_v3 = vpack.c.bf16 %v1223_v63, %v1221_v62  ;;  %v1912_v9 = vmul.f32 %v2789_v12, %v1688_v14  ;;  %v2375_v28 = vpack.c.bf16 %v1911_v37, %v1910_v59 }
 0x2ed   :  { %v2797_v7 = vpop.eup %2796  ;;  %v1824_v26 = vadd.f32 1.0, %v2795_v5  ;;  %2808 = vrcp.f32 %v1823_v24  ;;  %v1027_v34 = vpop.f32.mrb[56].mxu0 }
 0x2ee   :  { %v1825_v32 = vadd.f32 1.0, %v2797_v7  ;;  %v1913_v33 = vmul.f32 %v2791_v54, %v1689_v27  ;;  %2133 = vst [vmem:[#allocation10 + $0x18] sm:$0xff] %v2384_v3  ;;  %v2799_v60 = vpop.eup %2798  ;;  %2028 = vst [vmem:[#allocation8 + $0x50] sm:$0xff] %v2375_v28  ;;  %v1227_v10 = vpop.f32.mrb[56].mxu1  ;;  %v1690_v38 = vmul.f32 %v3477_v1, %v1027_v34 }
 0x2ef   :  { %2810 = vrcp.f32 %v1824_v26  ;;  %v2801_v40 = vpop.eup %2800  ;;  %v1029_v39 = vpop.f32.mrb[57].mxu0 }
 0x2f0   :  { %v2376_v49 = vpack.c.bf16 %v1913_v33, %v1912_v9  ;;  %2812 = vrcp.f32 %v1825_v32  ;;  %v1229_v51 = vpop.f32.mrb[57].mxu1  ;;  %v2803_v41 = vpop.eup %2802  ;;  %v1691_v53 = vmul.f32 %v3479_v6, %v1029_v39  ;;  %v1914_v46 = vmul.f32 %v2799_v60, %v1690_v38 }
 0x2f1   :  { %v1031_v44 = vpop.f32.mrb[58].mxu0  ;;  %v2385_v11 = vpack.c.bf16 %v1229_v51, %v1227_v10  ;;  %v1231_v42 = vpop.f32.mrb[58].mxu1 }
 0x2f2   :  { %2029 = vst [vmem:[#allocation8 + $0x58] sm:$0xff] %v2376_v49  ;;  %v2805_v21 = vpop.eup %2804  ;;  %v1692_v18 = vmul.f32 %v3477_v1, %v1031_v44  ;;  %v1033_v47 = vpop.f32.mrb[59].mxu0  ;;  %v1915_v61 = vmul.f32 %v2801_v40, %v1691_v53 }
 0x2f3   :  { %v1233_v36 = vpop.f32.mrb[59].mxu1  ;;  %v1693_v48 = vmul.f32 %v3479_v6, %v1033_v47  ;;  %2134 = vst [vmem:[#allocation10 + $0x20] sm:$0xff] %v2385_v11  ;;  %v2807_v54 = vpop.eup %2806 }
 0x2f4   :  { %v2386_v12 = vpack.c.bf16 %v1233_v36, %v1231_v42  ;;  %v1916_v23 = vmul.f32 %v2803_v41, %v1692_v18  ;;  %v2377_v35 = vpack.c.bf16 %v1915_v61, %v1914_v46 }
 0x2f5   :  { %v1917_v20 = vmul.f32 %v2805_v21, %v1693_v48  ;;  %v1037_v56 = vpop.f32.mrb[60].mxu0  ;;  %v1237_v52 = vpop.f32.mrb[60].mxu1 }
 0x2f6   :  { %2135 = vst [vmem:[#allocation10 + $0x28] sm:$0xff] %v2386_v12  ;;  %2030 = vst [vmem:[#allocation8 + $0x60] sm:$0xff] %v2377_v35  ;;  %v1694_v62 = vmul.f32 %v3477_v1, %v1037_v56  ;;  %v1039_v45 = vpop.f32.mrb[61].mxu0  ;;  %v1239_v59 = vpop.f32.mrb[61].mxu1 }
 0x2f7   :  { %v2378_v55 = vpack.c.bf16 %v1917_v20, %v1916_v23  ;;  %v2809_v25 = vpop.eup %2808  ;;  %v1695_v8 = vmul.f32 %v3479_v6, %v1039_v45  ;;  %v1041_v63 = vpop.f32.mrb[62].mxu0  ;;  %v2387_v5 = vpack.c.bf16 %v1239_v59, %v1237_v52 }
 0x2f8   :  { %v1241_v24 = vpop.f32.mrb[62].mxu1  ;;  %v1918_v27 = vmul.f32 %v2807_v54, %v1694_v62  ;;  %v1696_v3 = vmul.f32 %v3477_v1, %v1041_v63  ;;  %v1043_v7 = vpop.f32.mrb[63].mxu0 }
 0x2f9   :  { %v2811_v14 = vpop.eup %2810  ;;  %2031 = vst [vmem:[#allocation8 + $0x68] sm:$0xff] %v2378_v55  ;;  %v1243_v26 = vpop.f32.mrb[63].mxu1  ;;  %v1919_v9 = vmul.f32 %v2809_v25, %v1695_v8  ;;  %v1697_v32 = vmul.f32 %v3479_v6, %v1043_v7  ;;  %2136 = vst [vmem:[#allocation10 + $0x30] sm:$0xff] %v2387_v5 }
 0x2fa   :  { %v2813_v37 = vpop.eup %2812  ;;  %v2388_v28 = vpack.c.bf16 %v1243_v26, %v1241_v24  ;;  %v1920_v33 = vmul.f32 %v2811_v14, %v1696_v3 }
 0x2fb   :  { %v2379_v60 = vpack.c.bf16 %v1919_v9, %v1918_v27  ;;  %v1921_v49 = vmul.f32 %v2813_v37, %v1697_v32 }
 0x2fc   :  { %2137 = vst [vmem:[#allocation10 + $0x38] sm:$0xff] %v2388_v28 }
 0x2fd   :  { %2032 = vst [vmem:[#allocation8 + $0x70] sm:$0xff] %v2379_v60  ;;  %v2380_v34 = vpack.c.bf16 %v1921_v49, %v1920_v33  ;;  %v1047_v10 = vpop.f32.mrb[64].mxu0  ;;  %v1247_v40 = vpop.f32.mrb[64].mxu1 }
 0x2fe   :  { %v2237_v38 = vmul.f32 -1.442695, %v1047_v10  ;;  %v1049_v39 = vpop.f32.mrb[65].mxu0  ;;  %v1249_v51 = vpop.f32.mrb[65].mxu1 }
 0x2ff   :  { %2033 = vst [vmem:[#allocation8 + $0x78] sm:$0xff] %v2380_v34  ;;  %v2238_v41 = vmul.f32 -1.442695, %v1049_v39  ;;  %v1051_v53 = vpop.f32.mrb[66].mxu0  ;;  %v2389_v44 = vpack.c.bf16 %v1249_v51, %v1247_v40  ;;  %v1251_v11 = vpop.f32.mrb[66].mxu1 }
 0x300   :  { %2814 = vpow2.f32 %v2237_v38  ;;  %v2239_v42 = vmul.f32 -1.442695, %v1051_v53  ;;  %v1053_v21 = vpop.f32.mrb[67].mxu0  ;;  %v1253_v46 = vpop.f32.mrb[67].mxu1 }
 0x301   :  { %2933 = shalt.err (!%p2930_p6)
}
 0x302   :  { %s2934_s14 = scalar_lea.hbm %s3612_s6, 2048 }
 0x303   :  { %p2935_p7 = scmp.ne.s32.totalorder %s3612_s6, %s2934_s14  ;;  %p2938_p8 = scmp.lt.u32.totalorder %s2934_s14, %s3612_s6 }
 0x305   :  { %p2940_p9 = pnand %p2938_p8, %p2935_p7 }
 0x307   :  { %2943 = shalt.err (!%p2940_p9)
}
 0x308   :  { %2169 = dma.vmem_to_hbm [thread:$0]  %s2164_s8, 2048, %s3612_s6, [#allocation9], %s2997_s11, %s2997_s11, %s2998_s12   ;;  %2816 = vpow2.f32 %v2238_v41  ;;  %v2240_v18 = vmul.f32 -1.442695, %v1053_v21  ;;  %2138 = vst [vmem:[#allocation10 + $0x40] sm:$0xff] %v2389_v44  ;;  %v2390_v47 = vpack.c.bf16 %v1253_v46, %v1251_v11  ;;  %v1057_v36 = vpop.f32.mrb[68].mxu0  ;;  %v1298_v21 = vmul.f32 %v3477_v1, %v3442_v58 }
 0x309   :  { %2818 = vpow2.f32 %v2239_v42  ;;  %v1257_v61 = vpop.f32.mrb[68].mxu1  ;;  %v2241_v48 = vmul.f32 -1.442695, %v1057_v36  ;;  %v1059_v12 = vpop.f32.mrb[69].mxu0  ;;  %v1299_v36 = vmul.f32 %v3479_v6, %v3444_v15  ;;  %s3003_s6 = smov [#allocation10]   ;;  %v1301_v15 = vmul.f32 %v3479_v6, %v3448_v43 }
 0x30a   :  { %2820 = vpow2.f32 %v2240_v18  ;;  %2139 = vst [vmem:[#allocation10 + $0x48] sm:$0xff] %v2390_v47  ;;  %v1259_v23 = vpop.f32.mrb[69].mxu1  ;;  %v2242_v35 = vmul.f32 -1.442695, %v1059_v12  ;;  %v1061_v20 = vpop.f32.mrb[70].mxu0  ;;  %s2175_s21 = sshll.u32 %s3003_s6, 4  ;;  %s2176_s21 = int_to_ptr.vmem [resolvable:$true] %s2175_s21 }
 0x30b   :  { %v2391_v54 = vpack.c.bf16 %v1259_v23, %v1257_v61  ;;  %v1261_v55 = vpop.f32.mrb[70].mxu1  ;;  %2822 = vpow2.f32 %v2241_v48  ;;  %v2243_v56 = vmul.f32 -1.442695, %v1061_v20  ;;  %v1063_v52 = vpop.f32.mrb[71].mxu0  ;;  %v1300_v20 = vmul.f32 %v3477_v1, %v3446_v22  ;;  %s2944_s22 = scalar_lea.vmem %s2176_s21, 2048  ;;  %p2949_p11 = scmp.lt.s32.totalorder %s2176_s21, %s2176_s21 }
 0x30c   :  { %v1263_v25 = vpop.f32.mrb[71].mxu1  ;;  %2824 = vpow2.f32 %v2242_v35  ;;  %v2244_v62 = vmul.f32 -1.442695, %v1063_v52  ;;  %v2815_v59 = vpop.eup %2814  ;;  %p2945_p10 = scmp.ne.s32.totalorder %s2176_s21, %s2944_s22  ;;  %p2950_p12 = scmp.lt.s32.totalorder %s2944_s22, %s2944_s22 }
 0x30d   :  { %2140 = vst [vmem:[#allocation10 + $0x50] sm:$0xff] %v2391_v54  ;;  %v2392_v45 = vpack.c.bf16 %v1263_v25, %v1261_v55  ;;  %2826 = vpow2.f32 %v2243_v56  ;;  %v1426_v8 = vadd.f32 1.0, %v2815_v59  ;;  %v1067_v27 = vpop.f32.mrb[72].mxu0  ;;  %v1267_v3 = vpop.f32.mrb[72].mxu1 }
 0x30e   :  { %2828 = vpow2.f32 %v2244_v62  ;;  %v2245_v26 = vmul.f32 -1.442695, %v1067_v27  ;;  %v1069_v9 = vpop.f32.mrb[73].mxu0  ;;  %v1269_v32 = vpop.f32.mrb[73].mxu1  ;;  %p2951_p13 = por %p2950_p12, %p2949_p11 }
 0x30f   :  { %2141 = vst [vmem:[#allocation10 + $0x58] sm:$0xff] %v2392_v45  ;;  %2830 = vrcp.f32 %v1426_v8  ;;  %v2246_v28 = vmul.f32 -1.442695, %v1069_v9  ;;  %v1071_v33 = vpop.f32.mrb[74].mxu0  ;;  %v2393_v60 = vpack.c.bf16 %v1269_v32, %v1267_v3  ;;  %v1271_v49 = vpop.f32.mrb[74].mxu1 }
 0x310   :  { %v2247_v34 = vmul.f32 -1.442695, %v1071_v33  ;;  %v1073_v10 = vpop.f32.mrb[75].mxu0  ;;  %v1273_v40 = vpop.f32.mrb[75].mxu1  ;;  %p2952_p0 = pnand %p2951_p13, %p2945_p10 }
 0x311   :  { %v2248_v38 = vmul.f32 -1.442695, %v1073_v10  ;;  %2142 = vst [vmem:[#allocation10 + $0x60] sm:$0xff] %v2393_v60  ;;  %v2394_v39 = vpack.c.bf16 %v1273_v40, %v1271_v49 }
 0x312   :  { %v2817_v14 = vpop.eup %2816 }
 0x313   :  { %v2819_v63 = vpop.eup %2818  ;;  %v1427_v5 = vadd.f32 1.0, %v2817_v14  ;;  %2143 = vst [vmem:[#allocation10 + $0x68] sm:$0xff] %v2394_v39 }
 0x314   :  { %v2821_v24 = vpop.eup %2820  ;;  %v1428_v37 = vadd.f32 1.0, %v2819_v63 }
 0x315   :  { %2832 = vrcp.f32 %v1427_v5  ;;  %v1429_v7 = vadd.f32 1.0, %v2821_v24  ;;  %v2823_v51 = vpop.eup %2822  ;;  %v1077_v18 = vpop.f32.mrb[76].mxu0 }
 0x316   :  { %2834 = vrcp.f32 %v1428_v37  ;;  %v2825_v41 = vpop.eup %2824  ;;  %v1430_v53 = vadd.f32 1.0, %v2823_v51  ;;  %v1277_v47 = vpop.f32.mrb[76].mxu1  ;;  %v2249_v48 = vmul.f32 -1.442695, %v1077_v18 }
 0x317   :  { %2836 = vrcp.f32 %v1429_v7  ;;  %v2827_v44 = vpop.eup %2826  ;;  %v1431_v11 = vadd.f32 1.0, %v2825_v41  ;;  %v1079_v12 = vpop.f32.mrb[77].mxu0 }
 0x318   :  { %2838 = vpow2.f32 %v2245_v26  ;;  %v2829_v42 = vpop.eup %2828  ;;  %v1432_v46 = vadd.f32 1.0, %v2827_v44  ;;  %v1279_v23 = vpop.f32.mrb[77].mxu1  ;;  %v2250_v58 = vmul.f32 -1.442695, %v1079_v12 }
 0x319   :  { %2840 = vpow2.f32 %v2246_v28  ;;  %v1433_v61 = vadd.f32 1.0, %v2829_v42  ;;  %v2831_v35 = vpop.eup %2830  ;;  %v1081_v54 = vpop.f32.mrb[78].mxu0  ;;  %v2395_v55 = vpack.c.bf16 %v1279_v23, %v1277_v47 }
 0x31a   :  { %2842 = vpow2.f32 %v2247_v34  ;;  %v1281_v56 = vpop.f32.mrb[78].mxu1  ;;  %v1522_v25 = vmul.f32 %v2831_v35, %v1298_v21  ;;  %v2251_v62 = vmul.f32 -1.442695, %v1081_v54  ;;  %v1083_v45 = vpop.f32.mrb[79].mxu0 }
 0x31b   :  { %2844 = vpow2.f32 %v2248_v38  ;;  %v1283_v59 = vpop.f32.mrb[79].mxu1  ;;  %v2252_v63 = vmul.f32 -1.442695, %v1083_v45  ;;  %2144 = vst [vmem:[#allocation10 + $0x70] sm:$0xff] %v2395_v55 }
 0x31c   :  { %2846 = vrcp.f32 %v1430_v53  ;;  %v2396_v22 = vpack.c.bf16 %v1283_v59, %v1281_v56 }
 0x31d   :  { %2848 = vrcp.f32 %v1431_v11 }
 0x31e   :  { %2850 = vrcp.f32 %v1432_v46  ;;  %2145 = vst [vmem:[#allocation10 + $0x78] sm:$0xff] %v2396_v22 }
 0x31f   :  { %v2833_v52 = vpop.eup %2832  ;;  %2852 = vrcp.f32 %v1433_v61 }
 0x320   :  { %v2835_v14 = vpop.eup %2834  ;;  %v1523_v8 = vmul.f32 %v2833_v52, %v1299_v36  ;;  %2854 = vpow2.f32 %v2249_v48 }
 0x321   :  { %v2837_v5 = vpop.eup %2836  ;;  %v1524_v24 = vmul.f32 %v2835_v14, %v1300_v20  ;;  %2856 = vpow2.f32 %v2250_v58 }
 0x322   :  { %v2839_v37 = vpop.eup %2838  ;;  %v2349_v27 = vpack.c.bf16 %v1523_v8, %v1522_v25  ;;  %v1525_v3 = vmul.f32 %v2837_v5, %v1301_v15  ;;  %2858 = vpow2.f32 %v2251_v62 }
 0x323   :  { %v2841_v43 = vpop.eup %2840  ;;  %v1434_v7 = vadd.f32 1.0, %v2839_v37  ;;  %2860 = vpow2.f32 %v2252_v63 }
 0x324   :  { %2955 = shalt.err (!%p2952_p0)
}
 0x325   :  { %s2956_s0 = scalar_lea.hbm %s3613_s7, 2048 }
 0x326   :  { %p2957_p1 = scmp.ne.s32.totalorder %s3613_s7, %s2956_s0  ;;  %p2960_p2 = scmp.lt.u32.totalorder %s2956_s0, %s3613_s7 }
 0x328   :  { %p2962_p3 = pnand %p2960_p2, %p2957_p1 }
 0x32a   :  { %2965 = shalt.err (!%p2962_p3)
}
 0x32b   :  { %2181 = dma.vmem_to_hbm [thread:$0]  %s2176_s21, 2048, %s3613_s7, [#allocation9], %s2997_s11, %s2997_s11, %s2998_s12   ;;  %v2843_v26 = vpop.eup %2842  ;;  %1650 = vst [vmem:[#allocation7] sm:$0xff] %v2349_v27  ;;  %v2350_v9 = vpack.c.bf16 %v1525_v3, %v1524_v24  ;;  %v1435_v32 = vadd.f32 1.0, %v2841_v43  ;;  %v1302_v33 = vmul.f32 %v3477_v1, %v3450_v0  ;;  %2862 = vrcp.f32 %v1434_v7 }
 0x32c   :  { %v2845_v28 = vpop.eup %2844  ;;  %v1436_v60 = vadd.f32 1.0, %v2843_v26  ;;  %v1303_v34 = vmul.f32 %v3479_v6, %v3452_v17  ;;  %v1304_v38 = vmul.f32 %v3477_v1, %v3454_v2  ;;  %v1305_v41 = vmul.f32 %v3479_v6, %v3456_v19  ;;  %s3004_s7 = smov [#allocation7]  }
 0x32d   :  { %v2847_v49 = vpop.eup %2846  ;;  %1651 = vst [vmem:[#allocation7 + $0x8] sm:$0xff] %v2350_v9  ;;  %2864 = vrcp.f32 %v1435_v32  ;;  %v1437_v10 = vadd.f32 1.0, %v2845_v28  ;;  %v1306_v48 = vmul.f32 %v3477_v1, %v3458_v29  ;;  %v1307_v23 = vmul.f32 %v3479_v6, %v3460_v16  ;;  %s2151_s30 = sshll.u32 %s3004_s7, 4  ;;  %s2152_s30 = int_to_ptr.vmem [resolvable:$true] %s2151_s30 }
 0x32e   :  { %v2849_v40 = vpop.eup %2848  ;;  %v1526_v39 = vmul.f32 %v2847_v49, %v1302_v33  ;;  %2866 = vrcp.f32 %v1436_v60  ;;  %v1308_v20 = vmul.f32 %v3477_v1, %v3462_v30  ;;  %v1309_v55 = vmul.f32 %v3479_v6, %v3464_v31  ;;  %s2966_s2 = scalar_lea.vmem %s2152_s30, 2048  ;;  %p2971_p5 = scmp.lt.s32.totalorder %s2152_s30, %s2152_s30 }
 0x32f   :  { %v2851_v51 = vpop.eup %2850  ;;  %v1527_v0 = vmul.f32 %v2849_v40, %v1303_v34  ;;  %2868 = vrcp.f32 %v1437_v10  ;;  %v1310_v16 = vmul.f32 %v3477_v1, %v3466_v4  ;;  %v1311_v30 = vmul.f32 %v3479_v6, %v3468_v50  ;;  %p2967_p4 = scmp.ne.s32.totalorder %s2152_s30, %s2966_s2  ;;  %p2972_p6 = scmp.lt.s32.totalorder %s2966_s2, %s2966_s2 }
 0x330   :  { %v2853_v53 = vpop.eup %2852  ;;  %v1528_v44 = vmul.f32 %v2851_v51, %v1304_v38  ;;  %v1312_v14 = vmul.f32 %v3477_v1, %v3470_v13  ;;  %v1313_v63 = vmul.f32 %v3479_v6, %v3472_v57 }
 0x331   :  { %v2855_v11 = vpop.eup %2854  ;;  %v2351_v42 = vpack.c.bf16 %v1527_v0, %v1526_v39  ;;  %v1529_v17 = vmul.f32 %v2853_v53, %v1305_v41  ;;  %p2973_p7 = por %p2972_p6, %p2971_p5 }
 0x332   :  { %v2857_v21 = vpop.eup %2856  ;;  %v1438_v46 = vadd.f32 1.0, %v2855_v11 }
 0x333   :  { %v2859_v18 = vpop.eup %2858  ;;  %1652 = vst [vmem:[#allocation7 + $0x10] sm:$0xff] %v2351_v42  ;;  %v2352_v47 = vpack.c.bf16 %v1529_v17, %v1528_v44  ;;  %v1439_v36 = vadd.f32 1.0, %v2857_v21  ;;  %p2974_p8 = pnand %p2973_p7, %p2967_p4 }
 0x334   :  { %v2861_v2 = vpop.eup %2860  ;;  %2870 = vrcp.f32 %v1438_v46  ;;  %v1440_v61 = vadd.f32 1.0, %v2859_v18 }
 0x335   :  { %1653 = vst [vmem:[#allocation7 + $0x18] sm:$0xff] %v2352_v47  ;;  %2872 = vrcp.f32 %v1439_v36  ;;  %v1441_v19 = vadd.f32 1.0, %v2861_v2  ;;  %v2863_v12 = vpop.eup %2862 }
 0x336   :  { %2874 = vrcp.f32 %v1440_v61  ;;  %v1530_v58 = vmul.f32 %v2863_v12, %v1306_v48 }
 0x337   :  { %v2865_v35 = vpop.eup %2864  ;;  %2876 = vrcp.f32 %v1441_v19 }
 0x338   :  { %v2867_v54 = vpop.eup %2866  ;;  %v1531_v56 = vmul.f32 %v2865_v35, %v1307_v23 }
 0x339   :  { %v2869_v29 = vpop.eup %2868  ;;  %v1532_v52 = vmul.f32 %v2867_v54, %v1308_v20 }
 0x33a   :  { %v2353_v15 = vpack.c.bf16 %v1531_v56, %v1530_v58  ;;  %v1533_v25 = vmul.f32 %v2869_v29, %v1309_v55 }
 0x33c   :  { %1654 = vst [vmem:[#allocation7 + $0x20] sm:$0xff] %v2353_v15  ;;  %v2354_v62 = vpack.c.bf16 %v1533_v25, %v1532_v52 }
 0x33e   :  { %v2871_v45 = vpop.eup %2870  ;;  %1655 = vst [vmem:[#allocation7 + $0x28] sm:$0xff] %v2354_v62 }
 0x33f   :  { %v2873_v59 = vpop.eup %2872  ;;  %v1534_v31 = vmul.f32 %v2871_v45, %v1310_v16 }
 0x340   :  { %v2875_v8 = vpop.eup %2874  ;;  %v1535_v22 = vmul.f32 %v2873_v59, %v1311_v30 }
 0x341   :  { %v2877_v5 = vpop.eup %2876  ;;  %v1536_v24 = vmul.f32 %v2875_v8, %v1312_v14 }
 0x342   :  { %v2355_v4 = vpack.c.bf16 %v1535_v22, %v1534_v31  ;;  %v1537_v37 = vmul.f32 %v2877_v5, %v1313_v63 }
 0x344   :  { %1656 = vst [vmem:[#allocation7 + $0x30] sm:$0xff] %v2355_v4  ;;  %v2356_v27 = vpack.c.bf16 %v1537_v37, %v1536_v24 }
 0x346   :  { %1657 = vst [vmem:[#allocation7 + $0x38] sm:$0xff] %v2356_v27 }
 0x347   :  { %2977 = shalt.err (!%p2974_p8)
}
 0x348   :  { %s2978_s8 = scalar_lea.hbm %s3611_s5, 2048 }
 0x349   :  { %p2979_p9 = scmp.ne.s32.totalorder %s3611_s5, %s2978_s8  ;;  %p2982_p10 = scmp.lt.u32.totalorder %s2978_s8, %s3611_s5 }
 0x34b   :  { %p2984_p11 = pnand %p2982_p10, %p2979_p9 }
 0x34d   :  { %2987 = shalt.err (!%p2984_p11)
}
 0x34e   :  { %2157 = dma.vmem_to_hbm [thread:$0]  %s2152_s30, 2048, %s3611_s5, [#allocation4], %s2997_s11, %s2997_s11, %s2998_s12  }
 0x34f   :  { %2992 = dma.done.wait [#allocation4], 2048  }
 0x350   :  { %2993 = vsyncadd [#allocation4], 4294965248 }
 0x351   :  { %2994 = dma.done.wait [#allocation9], 4096  }
 0x352   :  { %2995 = vsyncadd [#allocation9], 4294963200 }
 0x353   :  { %2191 = vsyncpa [#allocation3], 1 }
 0x354   :  { %2192 = vsyncpa [#allocation6], 1 }
 0x355   :  { %2193 = vsyncpa [#allocation4], 1 }
 0x356   :  { %2194 = vsyncpa [#allocation9], 1 }

</bundles_post_ra>
